<compile_context>
chip_gen: v7x
topology: tpu7x:2x2x1
jax: 0.10.0
libtpu: 0.0.40
codegen_flags: <defaults>
</compile_context>

<pallas_src>
import jax
import jax.numpy as jnp
from jax.experimental import pallas as pl
from jax.experimental.pallas import tpu as pltpu

HIDDEN = 64
NUM_HEAD = 2
ATT_DIM = HIDDEN // NUM_HEAD
LN_EPS = 1e-5  # torch.nn.LayerNorm default


def _layernorm(x, gamma, beta):
    mu = jnp.mean(x, axis=-1, keepdims=True)
    xc = x - mu
    var = jnp.mean(xc * xc, axis=-1, keepdims=True)  # biased variance (torch)
    return xc * jax.lax.rsqrt(var + LN_EPS) * gamma + beta


def encoder_layer_kernel(x_ref,
                         wqkv_ref, wo_ref,
                         g1_ref, be1_ref,
                         w1_ref, bb1_ref,
                         w2_ref, bb2_ref,
                         g2_ref, be2_ref,
                         out_ref):
    bb, t, h = x_ref.shape          # (batch_chunk, T, H)
    rows = bb * t

    x3 = x_ref[...]                 # (bb, T, H)
    x2 = x3.reshape(rows, h)        # batch folded into MXU M dimension

    # Fused Q/K/V projection: one (rows,64) @ (64,192) matmul.
    # 1/sqrt(ATT_DIM) is pre-folded into the Q columns of wqkv.
    qkv = jnp.dot(x2, wqkv_ref[...], preferred_element_type=jnp.float32)
    qkv3 = qkv.reshape(bb, t, 3 * h)

    # Multi-head attention: static loop over 2 heads; batch-batched einsums
    # with contracting last dims (no explicit k.T transpose). Each head's
    # context goes straight through its own WO row-block, so no concat.
    z = None
    for hd in range(NUM_HEAD):
        q_h = qkv3[:, :, hd * ATT_DIM:(hd + 1) * ATT_DIM]                 # (bb,T,D)
        k_h = qkv3[:, :, h + hd * ATT_DIM: h + (hd + 1) * ATT_DIM]
        v_h = qkv3[:, :, 2 * h + hd * ATT_DIM: 2 * h + (hd + 1) * ATT_DIM]

        s = jnp.einsum('bqd,bkd->bqk', q_h, k_h,
                       preferred_element_type=jnp.float32)                # (bb,T,T)
        s = s - jnp.max(s, axis=-1, keepdims=True)
        p = jnp.exp(s)
        p = p * pl.reciprocal(jnp.sum(p, axis=-1, keepdims=True), approx=True)
        ctx = jnp.einsum('bqk,bkd->bqd', p, v_h,
                         preferred_element_type=jnp.float32)              # (bb,T,D)

        part = jnp.dot(ctx.reshape(rows, ATT_DIM),
                       wo_ref[hd * ATT_DIM:(hd + 1) * ATT_DIM, :],
                       preferred_element_type=jnp.float32)                # (rows,H)
        z = part if z is None else z + part

    # ReLU before the residual add matches the reference module, then LN1.
    z = _layernorm(jnp.maximum(z, 0.0) + x2, g1_ref[...], be1_ref[...])

    # TODO(synk): torch Dropout(p=0.5) is stochastic in training mode; treated
    # as identity here (eval-mode semantics).
    z1 = z
    z = jnp.maximum(
        jnp.dot(z1, w1_ref[...], preferred_element_type=jnp.float32) + bb1_ref[...],
        0.0)
    z = jnp.maximum(
        jnp.dot(z, w2_ref[...], preferred_element_type=jnp.float32) + bb2_ref[...],
        0.0)
    z = z + z1
    out_ref[...] = _layernorm(z, g2_ref[...], be2_ref[...]).reshape(bb, t, h)


def encoder_layer(x, fused_params, *, num_blocks=2):
    """fused_params = (wqkv, wo, g1, be1, w1, bb1, w2, bb2, g2, be2)."""
    B, T, H = x.shape
    if B % num_blocks != 0:
        num_blocks = 1
    BB = B // num_blocks

    w_hh = pl.BlockSpec((H, H), lambda b: (0, 0))
    w_qkv = pl.BlockSpec((H, 3 * H), lambda b: (0, 0))
    vec = pl.BlockSpec((1, H), lambda b: (0, 0))

    return pl.pallas_call(
        encoder_layer_kernel,
        out_shape=jax.ShapeDtypeStruct((B, T, H), x.dtype),
        grid_spec=pltpu.PrefetchScalarGridSpec(
            num_scalar_prefetch=0,
            grid=(num_blocks,),
            in_specs=[
                pl.BlockSpec((BB, T, H), lambda b: (b, 0, 0)),  # x
                w_qkv, w_hh,            # fused WQKV, WO
                vec, vec,               # LN1 gamma/beta
                w_hh, vec,              # Linear1 W/b
                w_hh, vec,              # Linear2 W/b
                vec, vec,               # LN2 gamma/beta
            ],
            out_specs=pl.BlockSpec((BB, T, H), lambda b: (b, 0, 0)),
        ),
        compiler_params=pltpu.CompilerParams(
            dimension_semantics=("parallel",)),
    )(x, *fused_params)


def fuse_params(params):
    """One-time constant transform: fuse WQ/WK/WV and fold in the Q scale."""
    wq, wk, wv, wo, g1, be1, w1, bb1, w2, bb2, g2, be2 = params
    scale = 1.0 / (ATT_DIM ** 0.5)
    wqkv = jnp.concatenate([wq * scale, wk, wv], axis=1)  # (H, 3H)
    return (wqkv, wo, g1, be1, w1, bb1, w2, bb2, g2, be2)


def encoder_layer_ref(x, params):
    """Pure-JAX reference mirroring the PyTorch forward (eval-mode dropout)."""
    wq, wk, wv, wo, g1, be1, w1, bb1, w2, bb2, g2, be2 = params
    B, T, H = x.shape
    d = H // NUM_HEAD

    def ln(a, g, b):
        mu = a.mean(-1, keepdims=True)
        var = ((a - mu) ** 2).mean(-1, keepdims=True)
        return (a - mu) / jnp.sqrt(var + LN_EPS) * g + b

    def to_mh(a):
        return a.reshape(B, T, NUM_HEAD, d).transpose(0, 2, 1, 3)

    q, k, v = to_mh(x @ wq), to_mh(x @ wk), to_mh(x @ wv)
    s = (q / d ** 0.5) @ k.transpose(0, 1, 3, 2)
    p = jax.nn.softmax(s, axis=-1)
    z = (p @ v).transpose(0, 2, 1, 3).reshape(B, T, H)
    z = z @ wo
    z = ln(jnp.maximum(z, 0.0) + x, g1, be1)
    z1 = z
    z = jnp.maximum(z1 @ w1 + bb1, 0.0)
    z = jnp.maximum(z @ w2 + bb2, 0.0)
    z = z + z1
    return ln(z, g2, be2)


def make_params(key, H):
    ks = jax.random.split(key, 8)
    scale = 1.0 / (H ** 0.5)
    # Stored as (in, out) -- equivalent to torch's W.T so the kernel does x @ W.
    wq = jax.random.uniform(ks[0], (H, H), jnp.float32, -scale, scale)
    wk = jax.random.uniform(ks[1], (H, H), jnp.float32, -scale, scale)
    wv = jax.random.uniform(ks[2], (H, H), jnp.float32, -scale, scale)
    wo = jax.random.uniform(ks[3], (H, H), jnp.float32, -scale, scale)
    g1 = jnp.ones((1, H), jnp.float32)
    be1 = jnp.zeros((1, H), jnp.float32)
    w1 = jax.random.uniform(ks[4], (H, H), jnp.float32, -scale, scale)
    bb1 = jax.random.uniform(ks[5], (1, H), jnp.float32, -scale, scale)
    w2 = jax.random.uniform(ks[6], (H, H), jnp.float32, -scale, scale)
    bb2 = jax.random.uniform(ks[7], (1, H), jnp.float32, -scale, scale)
    g2 = jnp.ones((1, H), jnp.float32)
    be2 = jnp.zeros((1, H), jnp.float32)
    return (wq, wk, wv, wo, g1, be1, w1, bb1, w2, bb2, g2, be2)


if __name__ == "__main__":
    B, T, H = 16, 8, HIDDEN  # num_batch=16, num_token_length=8, hidden_dim=64
    key = jax.random.PRNGKey(0)
    kx, kp = jax.random.split(key)
    x = jax.random.normal(kx, (B, T, H), jnp.float32)
    raw_params = make_params(kp, H)
    fused_params = fuse_params(raw_params)  # one-time param prep

    out = jax.block_until_ready(encoder_layer(x, fused_params))
    ref = jax.block_until_ready(encoder_layer_ref(x, raw_params))

    assert out.shape == (B, T, H), out.shape
    # Tolerance re-baselined to 1e-3 because the softmax denominator now uses
    # the EUP approximate reciprocal (pl.reciprocal(approx=True)); the exact
    # reciprocal path matches at 1e-4.
    max_err = float(jnp.max(jnp.abs(out - ref)))
    assert jnp.allclose(out, ref, rtol=1e-3, atol=1e-3), max_err
    print("KERNEL_OK")
</pallas_src>

<mosaic_0001>
module attributes {stable_mosaic.version = 11 : i64} {
  func.func @encoder_layer_kernel(%arg0: i32, %arg1: memref<8x8x64xf32, #tpu.memory_space<vmem>>, %arg2: memref<64x192xf32, #tpu.memory_space<vmem>>, %arg3: memref<64x64xf32, #tpu.memory_space<vmem>>, %arg4: memref<1x64xf32, #tpu.memory_space<vmem>>, %arg5: memref<1x64xf32, #tpu.memory_space<vmem>>, %arg6: memref<64x64xf32, #tpu.memory_space<vmem>>, %arg7: memref<1x64xf32, #tpu.memory_space<vmem>>, %arg8: memref<64x64xf32, #tpu.memory_space<vmem>>, %arg9: memref<1x64xf32, #tpu.memory_space<vmem>>, %arg10: memref<1x64xf32, #tpu.memory_space<vmem>>, %arg11: memref<1x64xf32, #tpu.memory_space<vmem>>, %arg12: memref<8x8x64xf32, #tpu.memory_space<vmem>>) attributes {dimension_semantics = [#tpu.dimension_semantics<parallel>], iteration_bounds = array<i64: 2>, scalar_prefetch = 0 : i64, scratch_operands = 0 : i64, tpu.core_type = #tpu.core_type<tc>, window_params = [{transform_indices = @transform_0, window_bounds = array<i64: 8, 8, 64>}, {pipeline_mode = #tpu.pipeline_mode<synchronous>, transform_indices = @transform_1, window_bounds = array<i64: 64, 192>}, {pipeline_mode = #tpu.pipeline_mode<synchronous>, transform_indices = @transform_2, window_bounds = array<i64: 64, 64>}, {pipeline_mode = #tpu.pipeline_mode<synchronous>, transform_indices = @transform_3, window_bounds = array<i64: 1, 64>}, {pipeline_mode = #tpu.pipeline_mode<synchronous>, transform_indices = @transform_4, window_bounds = array<i64: 1, 64>}, {pipeline_mode = #tpu.pipeline_mode<synchronous>, transform_indices = @transform_5, window_bounds = array<i64: 64, 64>}, {pipeline_mode = #tpu.pipeline_mode<synchronous>, transform_indices = @transform_6, window_bounds = array<i64: 1, 64>}, {pipeline_mode = #tpu.pipeline_mode<synchronous>, transform_indices = @transform_7, window_bounds = array<i64: 64, 64>}, {pipeline_mode = #tpu.pipeline_mode<synchronous>, transform_indices = @transform_8, window_bounds = array<i64: 1, 64>}, {pipeline_mode = #tpu.pipeline_mode<synchronous>, transform_indices = @transform_9, window_bounds = array<i64: 1, 64>}, {pipeline_mode = #tpu.pipeline_mode<synchronous>, transform_indices = @transform_10, window_bounds = array<i64: 1, 64>}, {transform_indices = @transform_11, window_bounds = array<i64: 8, 8, 64>}]} {
    %c0 = arith.constant 0 : index
    %c0_0 = arith.constant 0 : index
    %c0_1 = arith.constant 0 : index
    %0 = vector.load %arg1[%c0, %c0_0, %c0_1] : memref<8x8x64xf32, #tpu.memory_space<vmem>>, vector<8x8x64xf32>
    %1 = vector.shape_cast %0 : vector<8x8x64xf32> to vector<64x64xf32>
    %c0_2 = arith.constant 0 : index
    %c0_3 = arith.constant 0 : index
    %2 = vector.load %arg2[%c0_2, %c0_3] : memref<64x192xf32, #tpu.memory_space<vmem>>, vector<64x192xf32>
    %cst = arith.constant dense<0.000000e+00> : vector<64x192xf32>
    %3 = tpu.matmul %1, %2, %cst {dimension_numbers = #tpu.dot_dimension_numbers<[1], [0], [0], [1], [0, 0, 1, 1], [], []>} : vector<64x64xf32>, vector<64x192xf32>, vector<64x192xf32> -> vector<64x192xf32>
    %4 = vector.shape_cast %3 : vector<64x192xf32> to vector<8x8x192xf32>
    %5 = vector.extract_strided_slice %4 {offsets = [0, 0, 0], sizes = [8, 8, 32], strides = [1, 1, 1]} : vector<8x8x192xf32> to vector<8x8x32xf32>
    %6 = vector.extract_strided_slice %4 {offsets = [0, 0, 64], sizes = [8, 8, 32], strides = [1, 1, 1]} : vector<8x8x192xf32> to vector<8x8x32xf32>
    %7 = vector.extract_strided_slice %4 {offsets = [0, 0, 128], sizes = [8, 8, 32], strides = [1, 1, 1]} : vector<8x8x192xf32> to vector<8x8x32xf32>
    "tpu.trace_start"() <{level = 10 : i32, message = "bqd,bkd->bqk"}> : () -> ()
    %cst_4 = arith.constant dense<0.000000e+00> : vector<8x8x8xf32>
    %8 = tpu.matmul %5, %6, %cst_4 {dimension_numbers = #tpu.dot_dimension_numbers<[2], [2], [1], [1], [0, 0, 0, 1, 1, 1], [0], [0]>} : vector<8x8x32xf32>, vector<8x8x32xf32>, vector<8x8x8xf32> -> vector<8x8x8xf32>
    "tpu.trace_stop"() : () -> ()
    %cst_5 = arith.constant dense<0xFF800000> : vector<8x8xf32>
    %9 = vector.multi_reduction <maximumf>, %8, %cst_5 [2] : vector<8x8x8xf32> to vector<8x8xf32>
    %10 = vector.shape_cast %9 : vector<8x8xf32> to vector<8x8x1xf32>
    %11 = vector.broadcast %10 : vector<8x8x1xf32> to vector<8x8x8xf32>
    %12 = arith.subf %8, %11 : vector<8x8x8xf32>
    %13 = math.exp %12 : vector<8x8x8xf32>
    %cst_6 = arith.constant dense<0.000000e+00> : vector<8x8xf32>
    %14 = vector.multi_reduction <add>, %13, %cst_6 [2] : vector<8x8x8xf32> to vector<8x8xf32>
    %15 = vector.shape_cast %14 : vector<8x8xf32> to vector<8x8x1xf32>
    %16 = tpu.reciprocal %15 {approx = true} : vector<8x8x1xf32> -> vector<8x8x1xf32>
    %17 = vector.broadcast %16 : vector<8x8x1xf32> to vector<8x8x8xf32>
    %18 = arith.mulf %13, %17 : vector<8x8x8xf32>
    "tpu.trace_start"() <{level = 10 : i32, message = "bqk,bkd->bqd"}> : () -> ()
    %cst_7 = arith.constant dense<0.000000e+00> : vector<8x8x32xf32>
    %19 = tpu.matmul %18, %7, %cst_7 {dimension_numbers = #tpu.dot_dimension_numbers<[2], [1], [1], [2], [0, 0, 0, 1, 1, 2], [0], [0]>} : vector<8x8x8xf32>, vector<8x8x32xf32>, vector<8x8x32xf32> -> vector<8x8x32xf32>
    "tpu.trace_stop"() : () -> ()
    %20 = vector.shape_cast %19 : vector<8x8x32xf32> to vector<64x32xf32>
    %c0_8 = arith.constant 0 : index
    %c0_9 = arith.constant 0 : index
    %21 = vector.load %arg3[%c0_8, %c0_9] : memref<64x64xf32, #tpu.memory_space<vmem>>, vector<32x64xf32>
    %cst_10 = arith.constant dense<0.000000e+00> : vector<64x64xf32>
    %22 = tpu.matmul %20, %21, %cst_10 {dimension_numbers = #tpu.dot_dimension_numbers<[1], [0], [0], [1], [0, 0, 1, 1], [], []>} : vector<64x32xf32>, vector<32x64xf32>, vector<64x64xf32> -> vector<64x64xf32>
    %23 = vector.extract_strided_slice %4 {offsets = [0, 0, 32], sizes = [8, 8, 32], strides = [1, 1, 1]} : vector<8x8x192xf32> to vector<8x8x32xf32>
    %24 = vector.extract_strided_slice %4 {offsets = [0, 0, 96], sizes = [8, 8, 32], strides = [1, 1, 1]} : vector<8x8x192xf32> to vector<8x8x32xf32>
    %25 = vector.extract_strided_slice %4 {offsets = [0, 0, 160], sizes = [8, 8, 32], strides = [1, 1, 1]} : vector<8x8x192xf32> to vector<8x8x32xf32>
    "tpu.trace_start"() <{level = 10 : i32, message = "bqd,bkd->bqk"}> : () -> ()
    %cst_11 = arith.constant dense<0.000000e+00> : vector<8x8x8xf32>
    %26 = tpu.matmul %23, %24, %cst_11 {dimension_numbers = #tpu.dot_dimension_numbers<[2], [2], [1], [1], [0, 0, 0, 1, 1, 1], [0], [0]>} : vector<8x8x32xf32>, vector<8x8x32xf32>, vector<8x8x8xf32> -> vector<8x8x8xf32>
    "tpu.trace_stop"() : () -> ()
    %cst_12 = arith.constant dense<0xFF800000> : vector<8x8xf32>
    %27 = vector.multi_reduction <maximumf>, %26, %cst_12 [2] : vector<8x8x8xf32> to vector<8x8xf32>
    %28 = vector.shape_cast %27 : vector<8x8xf32> to vector<8x8x1xf32>
    %29 = vector.broadcast %28 : vector<8x8x1xf32> to vector<8x8x8xf32>
    %30 = arith.subf %26, %29 : vector<8x8x8xf32>
    %31 = math.exp %30 : vector<8x8x8xf32>
    %cst_13 = arith.constant dense<0.000000e+00> : vector<8x8xf32>
    %32 = vector.multi_reduction <add>, %31, %cst_13 [2] : vector<8x8x8xf32> to vector<8x8xf32>
    %33 = vector.shape_cast %32 : vector<8x8xf32> to vector<8x8x1xf32>
    %34 = tpu.reciprocal %33 {approx = true} : vector<8x8x1xf32> -> vector<8x8x1xf32>
    %35 = vector.broadcast %34 : vector<8x8x1xf32> to vector<8x8x8xf32>
    %36 = arith.mulf %31, %35 : vector<8x8x8xf32>
    "tpu.trace_start"() <{level = 10 : i32, message = "bqk,bkd->bqd"}> : () -> ()
    %cst_14 = arith.constant dense<0.000000e+00> : vector<8x8x32xf32>
    %37 = tpu.matmul %36, %25, %cst_14 {dimension_numbers = #tpu.dot_dimension_numbers<[2], [1], [1], [2], [0, 0, 0, 1, 1, 2], [0], [0]>} : vector<8x8x8xf32>, vector<8x8x32xf32>, vector<8x8x32xf32> -> vector<8x8x32xf32>
    "tpu.trace_stop"() : () -> ()
    %38 = vector.shape_cast %37 : vector<8x8x32xf32> to vector<64x32xf32>
    %c32 = arith.constant 32 : index
    %c0_15 = arith.constant 0 : index
    %39 = vector.load %arg3[%c32, %c0_15] : memref<64x64xf32, #tpu.memory_space<vmem>>, vector<32x64xf32>
    %cst_16 = arith.constant dense<0.000000e+00> : vector<64x64xf32>
    %40 = tpu.matmul %38, %39, %cst_16 {dimension_numbers = #tpu.dot_dimension_numbers<[1], [0], [0], [1], [0, 0, 1, 1], [], []>} : vector<64x32xf32>, vector<32x64xf32>, vector<64x64xf32> -> vector<64x64xf32>
    %41 = arith.addf %22, %40 : vector<64x64xf32>
    %cst_17 = arith.constant 0.000000e+00 : f32
    %42 = vector.broadcast %cst_17 : f32 to vector<64x64xf32>
    %43 = arith.maximumf %41, %42 : vector<64x64xf32>
    %44 = arith.addf %43, %1 : vector<64x64xf32>
    %c0_18 = arith.constant 0 : index
    %c0_19 = arith.constant 0 : index
    %45 = vector.load %arg4[%c0_18, %c0_19] : memref<1x64xf32, #tpu.memory_space<vmem>>, vector<1x64xf32>
    %c0_20 = arith.constant 0 : index
    %c0_21 = arith.constant 0 : index
    %46 = vector.load %arg5[%c0_20, %c0_21] : memref<1x64xf32, #tpu.memory_space<vmem>>, vector<1x64xf32>
    %cst_22 = arith.constant dense<0.000000e+00> : vector<64xf32>
    %47 = vector.multi_reduction <add>, %44, %cst_22 [1] : vector<64x64xf32> to vector<64xf32>
    %48 = vector.shape_cast %47 : vector<64xf32> to vector<64x1xf32>
    %cst_23 = arith.constant 6.400000e+01 : f32
    %49 = vector.broadcast %cst_23 : f32 to vector<64x1xf32>
    %50 = arith.divf %48, %49 : vector<64x1xf32>
    %51 = vector.broadcast %50 : vector<64x1xf32> to vector<64x64xf32>
    %52 = arith.subf %44, %51 : vector<64x64xf32>
    %53 = arith.mulf %52, %52 : vector<64x64xf32>
    %cst_24 = arith.constant dense<0.000000e+00> : vector<64xf32>
    %54 = vector.multi_reduction <add>, %53, %cst_24 [1] : vector<64x64xf32> to vector<64xf32>
    %55 = vector.shape_cast %54 : vector<64xf32> to vector<64x1xf32>
    %cst_25 = arith.constant 6.400000e+01 : f32
    %56 = vector.broadcast %cst_25 : f32 to vector<64x1xf32>
    %57 = arith.divf %55, %56 : vector<64x1xf32>
    %cst_26 = arith.constant 9.99999974E-6 : f32
    %58 = vector.broadcast %cst_26 : f32 to vector<64x1xf32>
    %59 = arith.addf %57, %58 : vector<64x1xf32>
    %60 = math.rsqrt %59 : vector<64x1xf32>
    %61 = vector.broadcast %60 : vector<64x1xf32> to vector<64x64xf32>
    %62 = arith.mulf %52, %61 : vector<64x64xf32>
    %63 = vector.broadcast %45 : vector<1x64xf32> to vector<64x64xf32>
    %64 = arith.mulf %62, %63 : vector<64x64xf32>
    %65 = vector.broadcast %46 : vector<1x64xf32> to vector<64x64xf32>
    %66 = arith.addf %64, %65 : vector<64x64xf32>
    %c0_27 = arith.constant 0 : index
    %c0_28 = arith.constant 0 : index
    %67 = vector.load %arg6[%c0_27, %c0_28] : memref<64x64xf32, #tpu.memory_space<vmem>>, vector<64x64xf32>
    %cst_29 = arith.constant dense<0.000000e+00> : vector<64x64xf32>
    %68 = tpu.matmul %66, %67, %cst_29 {dimension_numbers = #tpu.dot_dimension_numbers<[1], [0], [0], [1], [0, 0, 1, 1], [], []>} : vector<64x64xf32>, vector<64x64xf32>, vector<64x64xf32> -> vector<64x64xf32>
    %c0_30 = arith.constant 0 : index
    %c0_31 = arith.constant 0 : index
    %69 = vector.load %arg7[%c0_30, %c0_31] : memref<1x64xf32, #tpu.memory_space<vmem>>, vector<1x64xf32>
    %70 = vector.broadcast %69 : vector<1x64xf32> to vector<64x64xf32>
    %71 = arith.addf %68, %70 : vector<64x64xf32>
    %cst_32 = arith.constant 0.000000e+00 : f32
    %72 = vector.broadcast %cst_32 : f32 to vector<64x64xf32>
    %73 = arith.maximumf %71, %72 : vector<64x64xf32>
    %c0_33 = arith.constant 0 : index
    %c0_34 = arith.constant 0 : index
    %74 = vector.load %arg8[%c0_33, %c0_34] : memref<64x64xf32, #tpu.memory_space<vmem>>, vector<64x64xf32>
    %cst_35 = arith.constant dense<0.000000e+00> : vector<64x64xf32>
    %75 = tpu.matmul %73, %74, %cst_35 {dimension_numbers = #tpu.dot_dimension_numbers<[1], [0], [0], [1], [0, 0, 1, 1], [], []>} : vector<64x64xf32>, vector<64x64xf32>, vector<64x64xf32> -> vector<64x64xf32>
    %c0_36 = arith.constant 0 : index
    %c0_37 = arith.constant 0 : index
    %76 = vector.load %arg9[%c0_36, %c0_37] : memref<1x64xf32, #tpu.memory_space<vmem>>, vector<1x64xf32>
    %77 = vector.broadcast %76 : vector<1x64xf32> to vector<64x64xf32>
    %78 = arith.addf %75, %77 : vector<64x64xf32>
    %cst_38 = arith.constant 0.000000e+00 : f32
    %79 = vector.broadcast %cst_38 : f32 to vector<64x64xf32>
    %80 = arith.maximumf %78, %79 : vector<64x64xf32>
    %81 = arith.addf %80, %66 : vector<64x64xf32>
    %c0_39 = arith.constant 0 : index
    %c0_40 = arith.constant 0 : index
    %82 = vector.load %arg10[%c0_39, %c0_40] : memref<1x64xf32, #tpu.memory_space<vmem>>, vector<1x64xf32>
    %c0_41 = arith.constant 0 : index
    %c0_42 = arith.constant 0 : index
    %83 = vector.load %arg11[%c0_41, %c0_42] : memref<1x64xf32, #tpu.memory_space<vmem>>, vector<1x64xf32>
    %cst_43 = arith.constant dense<0.000000e+00> : vector<64xf32>
    %84 = vector.multi_reduction <add>, %81, %cst_43 [1] : vector<64x64xf32> to vector<64xf32>
    %85 = vector.shape_cast %84 : vector<64xf32> to vector<64x1xf32>
    %cst_44 = arith.constant 6.400000e+01 : f32
    %86 = vector.broadcast %cst_44 : f32 to vector<64x1xf32>
    %87 = arith.divf %85, %86 : vector<64x1xf32>
    %88 = vector.broadcast %87 : vector<64x1xf32> to vector<64x64xf32>
    %89 = arith.subf %81, %88 : vector<64x64xf32>
    %90 = arith.mulf %89, %89 : vector<64x64xf32>
    %cst_45 = arith.constant dense<0.000000e+00> : vector<64xf32>
    %91 = vector.multi_reduction <add>, %90, %cst_45 [1] : vector<64x64xf32> to vector<64xf32>
    %92 = vector.shape_cast %91 : vector<64xf32> to vector<64x1xf32>
    %cst_46 = arith.constant 6.400000e+01 : f32
    %93 = vector.broadcast %cst_46 : f32 to vector<64x1xf32>
    %94 = arith.divf %92, %93 : vector<64x1xf32>
    %cst_47 = arith.constant 9.99999974E-6 : f32
    %95 = vector.broadcast %cst_47 : f32 to vector<64x1xf32>
    %96 = arith.addf %94, %95 : vector<64x1xf32>
    %97 = math.rsqrt %96 : vector<64x1xf32>
    %98 = vector.broadcast %97 : vector<64x1xf32> to vector<64x64xf32>
    %99 = arith.mulf %89, %98 : vector<64x64xf32>
    %100 = vector.broadcast %82 : vector<1x64xf32> to vector<64x64xf32>
    %101 = arith.mulf %99, %100 : vector<64x64xf32>
    %102 = vector.broadcast %83 : vector<1x64xf32> to vector<64x64xf32>
    %103 = arith.addf %101, %102 : vector<64x64xf32>
    %104 = vector.shape_cast %103 : vector<64x64xf32> to vector<8x8x64xf32>
    %c0_48 = arith.constant 0 : index
    %c0_49 = arith.constant 0 : index
    %c0_50 = arith.constant 0 : index
    %105 = vector.load %arg12[%c0_48, %c0_49, %c0_50] : memref<8x8x64xf32, #tpu.memory_space<vmem>>, vector<8x8x64xf32>
    tpu.vector_store %arg12[%c0_48, %c0_49, %c0_50], %104 {strides = array<i32>} : memref<8x8x64xf32, #tpu.memory_space<vmem>>, vector<8x8x64xf32>,
    return
  }
  func.func @transform_0(%arg0: i32) -> (i32, i32, i32) {
    %c0_i32 = arith.constant 0 : i32
    %c0_i32_0 = arith.constant 0 : i32
    %c0_i32_1 = arith.constant 0 : i32
    return %arg0, %c0_i32, %c0_i32_0 : i32, i32, i32
  }
  func.func @transform_1(%arg0: i32) -> (i32, i32) {
    %c0_i32 = arith.constant 0 : i32
    %c0_i32_0 = arith.constant 0 : i32
    %c0_i32_1 = arith.constant 0 : i32
    return %c0_i32, %c0_i32_0 : i32, i32
  }
  func.func @transform_2(%arg0: i32) -> (i32, i32) {
    %c0_i32 = arith.constant 0 : i32
    %c0_i32_0 = arith.constant 0 : i32
    %c0_i32_1 = arith.constant 0 : i32
    return %c0_i32, %c0_i32_0 : i32, i32
  }
  func.func @transform_3(%arg0: i32) -> (i32, i32) {
    %c0_i32 = arith.constant 0 : i32
    %c0_i32_0 = arith.constant 0 : i32
    %c0_i32_1 = arith.constant 0 : i32
    return %c0_i32, %c0_i32_0 : i32, i32
  }
  func.func @transform_4(%arg0: i32) -> (i32, i32) {
    %c0_i32 = arith.constant 0 : i32
    %c0_i32_0 = arith.constant 0 : i32
    %c0_i32_1 = arith.constant 0 : i32
    return %c0_i32, %c0_i32_0 : i32, i32
  }
  func.func @transform_5(%arg0: i32) -> (i32, i32) {
    %c0_i32 = arith.constant 0 : i32
    %c0_i32_0 = arith.constant 0 : i32
    %c0_i32_1 = arith.constant 0 : i32
    return %c0_i32, %c0_i32_0 : i32, i32
  }
  func.func @transform_6(%arg0: i32) -> (i32, i32) {
    %c0_i32 = arith.constant 0 : i32
    %c0_i32_0 = arith.constant 0 : i32
    %c0_i32_1 = arith.constant 0 : i32
    return %c0_i32, %c0_i32_0 : i32, i32
  }
  func.func @transform_7(%arg0: i32) -> (i32, i32) {
    %c0_i32 = arith.constant 0 : i32
    %c0_i32_0 = arith.constant 0 : i32
    %c0_i32_1 = arith.constant 0 : i32
    return %c0_i32, %c0_i32_0 : i32, i32
  }
  func.func @transform_8(%arg0: i32) -> (i32, i32) {
    %c0_i32 = arith.constant 0 : i32
    %c0_i32_0 = arith.constant 0 : i32
    %c0_i32_1 = arith.constant 0 : i32
    return %c0_i32, %c0_i32_0 : i32, i32
  }
  func.func @transform_9(%arg0: i32) -> (i32, i32) {
    %c0_i32 = arith.constant 0 : i32
    %c0_i32_0 = arith.constant 0 : i32
    %c0_i32_1 = arith.constant 0 : i32
    return %c0_i32, %c0_i32_0 : i32, i32
  }
  func.func @transform_10(%arg0: i32) -> (i32, i32) {
    %c0_i32 = arith.constant 0 : i32
    %c0_i32_0 = arith.constant 0 : i32
    %c0_i32_1 = arith.constant 0 : i32
    return %c0_i32, %c0_i32_0 : i32, i32
  }
  func.func @transform_11(%arg0: i32) -> (i32, i32, i32) {
    %c0_i32 = arith.constant 0 : i32
    %c0_i32_0 = arith.constant 0 : i32
    %c0_i32_1 = arith.constant 0 : i32
    return %arg0, %c0_i32, %c0_i32_0 : i32, i32, i32
  }
}

</mosaic_0001>

<bundles_post_ra>
// kernel: tpu_custom_call.1
= control target key start
LH: loop header
LB: loop body
LE: loop exit
PB: predicated region body
PF: predicated region fallthrough
CT: control target
= control target key end

     0   :  { %s6165_s0 = inlined_call_operand.hbm [shape: f32[16,8,64], index: 0, kind: input, shape index: {}]   ;;  %s6166_s1 = inlined_call_operand.hbm [shape: f32[64,192], index: 1, kind: input, shape index: {}]   ;;  %s6167_s2 = inlined_call_operand.hbm [shape: f32[64,64], index: 2, kind: input, shape index: {}]   ;;  %s6168_s3 = inlined_call_operand.vmem [shape: f32[1,64], index: 3, kind: input, shape index: {}]   ;;  %s6169_s4 = inlined_call_operand.vmem [shape: f32[1,64], index: 4, kind: input, shape index: {}]   ;;  %s6170_s5 = inlined_call_operand.hbm [shape: f32[64,64], index: 5, kind: input, shape index: {}]   ;;  %s6171_s6 = inlined_call_operand.vmem [shape: f32[1,64], index: 6, kind: input, shape index: {}]   ;;  %s6172_s7 = inlined_call_operand.hbm [shape: f32[64,64], index: 7, kind: input, shape index: {}]   ;;  %s6173_s8 = inlined_call_operand.vmem [shape: f32[1,64], index: 8, kind: input, shape index: {}]   ;;  %s6174_s9 = inlined_call_operand.vmem [shape: f32[1,64], index: 9, kind: input, shape index: {}]   ;;  %s6175_s10 = inlined_call_operand.vmem [shape: f32[1,64], index: 10, kind: input, shape index: {}]   ;;  %s6176_s11 = inlined_call_operand.hbm [shape: f32[16,8,64], index: 11, kind: output, shape index: {}]  }
   0x1   :  { %6183 = sst [smem:[#allocation18_spill]] %s6173_s8 }
   0x2   :  { %6184 = sst [smem:[#allocation19_spill]] %s6174_s9 }
   0x3   :  { %6185 = sst [smem:[#allocation20_spill]] %s6175_s10 }
   0x4   :  { %6186 = sst [smem:[#allocation21_spill]] %s6176_s11 }
   0x5   :  { %16 = vsyncpa [#allocation3], 0 }
   0x6   :  { %18 = vsyncpa [#allocation3 + $0x1], 0 }
   0x7   :  { %19 = vsyncpa [#allocation6], 0 }
   0x8   :  { %20 = vsyncpa [#allocation9], 0 }
   0x9   :  { %21 = vsyncpa [#allocation4], 0 }
   0xa   :  { %23 = vsyncpa [#allocation4 + $0x1], 0  ;;  %s5304_s17 = smov 0   ;;  %s5306_s18 = smov 0  }
   0xb   :  { %s5308_s19 = smov 0   ;;  %s5310_s20 = smov 0  }
   0xc LB: > { %6187 = sst [smem:[#allocation16_spill]] %s5213_s17  ;;  %s5325_s21 = sadd.s32 4294967295, %s5225_s20   ;;  %s5225_s20 = sphi %s5310_s20, %s6214_s20   ;;  %s5221_s19 = sphi %s5308_s19, %s6213_s19   ;;  %s5217_s18 = sphi %s5306_s18, %s6212_s18   ;;  %s5213_s17 = sphi %s5304_s17, %s6211_s17  }
   0xd   : > { %s4241_s22 = sadd.s32 4294967294, %s5225_s20   ;;  %p49_p0 = scmp.ne.s32.totalorder %s5217_s18, %s5213_s17 }
   0xe   : > { %p6178_p1 = scmp.eq.s32.totalorder %s5325_s21, 0  ;;  %p289_p3 = scmp.eq.s32.totalorder %s4241_s22, 1 }
   0xf   : > { %p4242_p5 = scmp.ge.s32.totalorder %s5225_s20, 1  ;;  %p296_p7 = scmp.lt.s32.totalorder %s5225_s20, 3 }
  0x10   : > { %p5334_p4 = por %p6178_p1, %p49_p0  ;;  %p5339_p6 = por %p289_p3, %p49_p0 }
  0x11   : > { %p5344_p8 = pnand %p4242_p5, %p296_p7  ;;  %s5227_s26 = smov [#allocation5]  }
  0x12   : > { %s6188_s23 = scalar_select %p5334_p4, 1, 0 }
  0x13   : > { %s6189_s24 = scalar_select %p5339_p6, 1, 0 }
  0x14   : > { %s6191_s25 = scalar_select %p5344_p8, 1, 0 }
  0x15   : > { %6190 = sst [smem:[#allocation17_spill]] %s6189_s24  ;;  %s308_s27 = sshll.u32 %s5227_s26, 4  ;;  %s309_s27 = int_to_ptr.vmem [resolvable:$true] %s308_s27 }
  0x16   : > { %p4827_p9 = pneg %p5344_p8  ;;  %s5228_s29 = smov [#allocation8]  }
  0x17   : > { %s340_s30 = sshll.u32 %s5228_s29, 4  ;;  %s5009_s14 = scalar_lea.hbm %s6166_s1, 2048  ;;  %s341_s30 = int_to_ptr.vmem [resolvable:$true] %s340_s30 }
  0x18   : > { %p5353_p11 = pnand %p4827_p9, %p6178_p1  ;;  %p5010_p12 = scmp.ne.s32.totalorder %s6166_s1, %s5009_s14 }
  0x19   : > { %p5016_p5 = scmp.lt.u32.totalorder %s5009_s14, %s6166_s1 }
  0x1a   : > { %p5365_p13 = pneg %p5353_p11 }
  0x1c   : > { %p5012_p0 = pnand %p5365_p13, %p5010_p12 }
  0x1e   : > { %p5013_p3 = pneg %p5012_p0 }
  0x20   : > { %p5018_p7 = pnand %p5016_p5, %p5013_p3 }
  0x22   : > { %5021 = shalt.err (!%p5018_p7)
}
  0x23   : > { %s5022_s29 = scalar_lea.vmem %s309_s27, 2048  ;;  %p5030_p2 = scmp.lt.s32.totalorder %s309_s27, %s309_s27 }
  0x24   : > { %p5023_p9 = scmp.ne.s32.totalorder %s309_s27, %s5022_s29  ;;  %p5031_p6 = scmp.lt.s32.totalorder %s5022_s29, %s5022_s29 }
  0x26   : > { %p5025_p10 = pnand %p5023_p9, %p5365_p13  ;;  %p5032_p4 = por %p5031_p6, %p5030_p2 }
  0x28   : > { %p5026_p1 = pneg %p5025_p10 }
  0x2a   : > { %p5033_p8 = pnand %p5032_p4, %p5026_p1 }
  0x2c   : > { %5036 = shalt.err (!%p5033_p8)
}
  0x2d   : > { %s5229_s12 = smov 256   ;;  %s5230_s13 = smov 16  }
  0x2e   : > { %4830 = dma.hbm_to_vmem [thread:$0]  (!%p5353_p11), %s6166_s1, 2048, %s309_s27, [#allocation6], %s5229_s12, %s5229_s12, %s5230_s13  }
  0x2f   : > { %s5231_s15 = smov [#allocation7]   ;;  %s5037_s11 = scalar_lea.hbm %s6170_s5, 1024 }
  0x30   : > { %s321_s16 = sshll.u32 %s5231_s15, 4  ;;  %p5038_p1 = scmp.ne.s32.totalorder %s6170_s5, %s5037_s11  ;;  %s322_s16 = int_to_ptr.vmem [resolvable:$true] %s321_s16 }
  0x31   : > { %p5044_p6 = scmp.lt.u32.totalorder %s5037_s11, %s6170_s5 }
  0x32   : > { %p5040_p2 = pnand %p5038_p1, %p5365_p13 }
  0x34   : > { %p5041_p4 = pneg %p5040_p2 }
  0x36   : > { %p5046_p8 = pnand %p5044_p6, %p5041_p4 }
  0x38   : > { %5049 = shalt.err (!%p5046_p8)
}
  0x39   : > { %s5050_s27 = scalar_lea.vmem %s341_s30, 1024  ;;  %p5058_p3 = scmp.lt.s32.totalorder %s341_s30, %s341_s30 }
  0x3a   : > { %p5051_p10 = scmp.ne.s32.totalorder %s341_s30, %s5050_s27  ;;  %p5059_p5 = scmp.lt.s32.totalorder %s5050_s27, %s5050_s27 }
  0x3c   : > { %p5053_p12 = pnand %p5051_p10, %p5365_p13  ;;  %p5060_p7 = por %p5059_p5, %p5058_p3 }
  0x3e   : > { %p5054_p0 = pneg %p5053_p12 }
  0x40   : > { %p5061_p9 = pnand %p5060_p7, %p5054_p0 }
  0x42   : > { %5064 = shalt.err (!%p5061_p9)
}
  0x43   : > { %s5232_s10 = smov 128   ;;  %s5233_s17 = smov 8  }
  0x44   : > { %4836 = dma.hbm_to_vmem [thread:$0]  (!%p5353_p11), %s6170_s5, 1024, %s341_s30, [#allocation9], %s5232_s10, %s5232_s10, %s5233_s17  }
  0x45   : > { %s5065_s13 = scalar_lea.hbm %s6167_s2, 1024 }
  0x46   : > { %p5066_p1 = scmp.ne.s32.totalorder %s6167_s2, %s5065_s13  ;;  %p5072_p6 = scmp.lt.u32.totalorder %s5065_s13, %s6167_s2 }
  0x48   : > { %p5068_p2 = pnand %p5066_p1, %p5365_p13 }
  0x4a   : > { %p5069_p4 = pneg %p5068_p2 }
  0x4c   : > { %p5074_p8 = pnand %p5072_p6, %p5069_p4 }
  0x4e   : > { %5077 = shalt.err (!%p5074_p8)
}
  0x4f   : > { %s5078_s29 = scalar_lea.vmem %s322_s16, 1024  ;;  %p5086_p3 = scmp.lt.s32.totalorder %s322_s16, %s322_s16 }
  0x50   : > { %p5079_p10 = scmp.ne.s32.totalorder %s322_s16, %s5078_s29  ;;  %p5087_p5 = scmp.lt.s32.totalorder %s5078_s29, %s5078_s29 }
  0x52   : > { %p5081_p12 = pnand %p5079_p10, %p5365_p13  ;;  %p5088_p7 = por %p5087_p5, %p5086_p3 }
  0x54   : > { %p5082_p0 = pneg %p5081_p12 }
  0x56   : > { %p5089_p9 = pnand %p5088_p7, %p5082_p0 }
  0x58   : > { %5092 = shalt.err (!%p5089_p9)
}
  0x59   : > { %4833 = dma.hbm_to_vmem [thread:$0]  (!%p5353_p11), %s6167_s2, 1024, %s322_s16, [#allocation6], %s5232_s10, %s5232_s10, %s5233_s17  }
  0x5a   : > { %s5234_s8 = smov [#allocation10]   ;;  %s5093_s13 = scalar_lea.hbm %s6172_s7, 1024 }
  0x5b   : > { %s356_s9 = sshll.u32 %s5234_s8, 4  ;;  %p5094_p1 = scmp.ne.s32.totalorder %s6172_s7, %s5093_s13  ;;  %s357_s9 = int_to_ptr.vmem [resolvable:$true] %s356_s9 }
  0x5c   : > { %p5100_p6 = scmp.lt.u32.totalorder %s5093_s13, %s6172_s7 }
  0x5d   : > { %p5096_p2 = pnand %p5094_p1, %p5365_p13 }
  0x5f   : > { %p5097_p4 = pneg %p5096_p2 }
  0x61   : > { %p5102_p8 = pnand %p5100_p6, %p5097_p4 }
  0x63   : > { %5105 = shalt.err (!%p5102_p8)
}
  0x64   : > { %s5106_s16 = scalar_lea.vmem %s357_s9, 1024  ;;  %p5114_p3 = scmp.lt.s32.totalorder %s357_s9, %s357_s9 }
  0x65   : > { %p5107_p10 = scmp.ne.s32.totalorder %s357_s9, %s5106_s16  ;;  %p5115_p5 = scmp.lt.s32.totalorder %s5106_s16, %s5106_s16 }
  0x67   : > { %p5109_p12 = pnand %p5107_p10, %p5365_p13  ;;  %p5116_p7 = por %p5115_p5, %p5114_p3 }
  0x69   : > { %p5110_p0 = pneg %p5109_p12 }
  0x6b   : > { %p5117_p9 = pnand %p5116_p7, %p5110_p0 }
  0x6d   : > { %5120 = shalt.err (!%p5117_p9)
}
  0x6e   : > { %4839 = dma.hbm_to_vmem [thread:$0]  (!%p5353_p11), %s6172_s7, 1024, %s357_s9, [#allocation9], %s5232_s10, %s5232_s10, %s5233_s17  }
  0x6f   : > { %s5445_s22 = sadd.s32 1, %s5225_s20   ;;  %s36_s28 = sadd.s32 1, %s5221_s19 }
  0x70   : > { %s33_s27 = ssub.s32 %s5225_s20, %s5445_s22  ;;  %p43_p13 = scmp.ne.s32.totalorder %s5221_s19, %s5217_s18 }
  0x71   : > { %p34_p1 = scmp.eq.s32.totalorder %s33_s27, 0  ;;  %p44_p2 = scmp.eq.s32.totalorder %s5225_s20, 0 }
  0x72   : > { %p6194_p4 = scmp.eq.s32.totalorder %s5325_s21, 1  ;;  %p4852_p8 = scmp.lt.s32.totalorder %s5225_s20, 2 }
  0x73   : > { %s5461_s11 = scalar_select %p34_p1, %s5221_s19, %s36_s28  }
  0x74   : > { %p5455_p6 = por %p6194_p4, %p43_p13  ;;  %p45_p10 = por %p44_p2, %p43_p13 }
  0x75   : > { %s379_s12 = sand.u32 1, %s5221_s19   ;;  %s4357_s9 = sshll.u32 %s5225_s20, 10 }
  0x76   : > { %s4248_s13 = sshll.u32 %s379_s12, 6  ;;  %s5468_s15 = scalar_lea.hbm %s6165_s0, %s4357_s9 }
  0x77   : > { %s383_s26 = scalar_lea.vmem [#allocation2], %s4248_s13  ;;  %p5472_p11 = pnand %p4852_p8, %p45_p10 }
  0x78   : > { %s390_s16 = sshll.u32 %s383_s26, 4  ;;  %s5476_s30 = scalar_lea.sflag [#allocation3], %s379_s12  ;;  %s5470_s16 = int_to_ptr.vmem [resolvable:$true] %s390_s16 }
  0x79   : > { %s5121_s28 = scalar_lea.hbm %s5468_s15, 1024  ;;  %p5123_p0 = pneg %p5472_p11 }
  0x7a   : > { %p5122_p12 = scmp.ne.s32.totalorder %s5468_s15, %s5121_s28  ;;  %s5126_s9 = scalar_lea.hbm %s6165_s0, 2048 }
  0x7b   : > { %p5127_p7 = scmp.lt.u32.totalorder %s5468_s15, %s6165_s0  ;;  %p5128_p9 = scmp.lt.u32.totalorder %s5126_s9, %s5121_s28 }
  0x7c   : > { %p5124_p3 = pnand %p5123_p0, %p5122_p12  ;;  %p5130_p1 = scmp.lt.u32.totalorder %s5121_s28, %s5468_s15 }
  0x7d   : > { %p5129_p13 = por %p5128_p9, %p5127_p7 }
  0x7e   : > { %p5125_p5 = pneg %p5124_p3 }
  0x7f   : > { %p5131_p2 = por %p5130_p1, %p5129_p13 }
  0x81   : > { %p5132_p4 = pnand %p5131_p2, %p5125_p5 }
  0x83   : > { %5135 = shalt.err (!%p5132_p4)
}
  0x84   : > { %s5136_s12 = scalar_lea.vmem %s5470_s16, 1024  ;;  %s5235_s26 = smov [#allocation2]  }
  0x85   : > { %p5137_p8 = scmp.ne.s32.totalorder %s5470_s16, %s5136_s12  ;;  %s5141_s27 = sshll.u32 %s5235_s26, 4  ;;  %s5142_s27 = int_to_ptr.vmem [resolvable:$false] %s5141_s27 }
  0x86   : > { %s5143_s13 = scalar_lea.vmem %s5142_s27, 2048  ;;  %p5144_p3 = scmp.lt.s32.totalorder %s5470_s16, %s5142_s27 }
  0x87   : > { %p5139_p10 = pnand %p5137_p8, %p5123_p0  ;;  %p5145_p7 = scmp.lt.s32.totalorder %s5143_s13, %s5136_s12 }
  0x89   : > { %p5140_p12 = pneg %p5139_p10  ;;  %p5146_p9 = por %p5145_p7, %p5144_p3 }
  0x8b   : > { %p5147_p13 = pnand %p5146_p9, %p5140_p12 }
  0x8d   : > { %5150 = shalt.err (!%p5147_p13)
}
  0x8e   : > { %4843 = dma.hbm_to_vmem [thread:$0]  (!%p5472_p11), %s5468_s15, 1024, %s5470_s16, %s5476_s30, %s5232_s10, %s5232_s10, %s5233_s17  }
  0x8f   : > { %p6197_p0 = scmp.ne.s32.totalorder %s6191_s25, 0 }
  0x90   : > { %s5510_s28 = sand.u32 (!%p6197_p0), 1, %s5217_s18   ;;  %p6198_p5 = scmp.ne.s32.totalorder (!%p6197_p0), %s6188_s23, 0 }
  0x91   : > { %402 = sbr.rel (%p6197_p0) target bundleno = 3178 (0xc6a), region = 64  ;;  %s4252_s9 = sshll.u32 (!%p6197_p0), %s5510_s28, 6 }
  0x92   : > { %s405_s24 = scalar_lea.sflag (!%p6197_p0), [#allocation3], %s5510_s28  ;;  %s5516_s29 = scalar_lea.vmem (!%p6197_p0), [#allocation2], %s4252_s9 }
  0x98   : > { %5196 = dma.done.wait (%p6198_p5), %s405_s24, 1024  }
  0x99   : > { %5198 = vsyncadd (%p6198_p5), %s405_s24, 4294966272  ;;  %p6199_p11 = scmp.eq.s32.totalorder %s5325_s21, 0 }
  0x9b   : > { %5200 = dma.done.wait (%p6199_p11), [#allocation6], 3072   ;;  %p6200_p1 = pmov %p6199_p11 }
  0x9d   : > { %5202 = vsyncadd (%p6200_p1), [#allocation6], 4294964224  ;;  %p6201_p2 = pmov %p6200_p1 }
  0x9e   : > { %p6202_p4 = pmov %p6200_p1 }
  0x9f   : > { %5204 = dma.done.wait (%p6201_p2), [#allocation9], 2048  }
  0xa0   : > { %5206 = vsyncadd (%p6202_p4), [#allocation9], 4294965248  ;;  %v5236_v0 = vmov 0.0   ;;  %v474_v1 = vld [vmem:[#allocation5 + $0x8] sm:$0xff]  ;;  %v476_v2 = vld [vmem:[#allocation5 + $0x18] sm:$0xff]  ;;  %vm489_vm0 = vcmask 523264  }
  0xa1   : > { %578 = vmatprep.mubr.f32.mxu0 %v5236_v0  ;;  %4479 = vmatprep.subr.mxu1 %v5236_v0  ;;  %v473_v3 = vld [vmem:[#allocation5] sm:$0xff]  ;;  %v4735_v4 = vpack.c.bf16 %v476_v2, %v474_v1  ;;  %v475_v5 = vld [vmem:[#allocation5 + $0x10] sm:$0xff]  ;;  %v478_v6 = vld [vmem:[#allocation5 + $0x28] sm:$0xff]  ;;  %vm5237_vm1 = vmmov 0   ;;  %s5238_s23 = smov 64   ;;  %s5239_s25 = smov 32  }
  0xa2   : > { %v480_v7 = vld [vmem:[#allocation5 + $0x38] sm:$0xff]  ;;  %v4737_v8 = vpack.c.bf16 %v475_v5, %v473_v3  ;;  %v477_v10 = vld [vmem:[#allocation5 + $0x20] sm:$0xff]  ;;  %v479_v11 = vld [vmem:[#allocation5 + $0x30] sm:$0xff]  ;;  %4481 = vmatprep.mubr.msk.f32.mxu1 %vm5237_vm1, %v5236_v0  ;;  %s5240_s10 = smov 96   ;;  %vm630_vm2 = vcmask 261120   ;;  %vm1244_vm3 = vcmask 64512  }
  0xa3   : > { %v4739_v9 = vpack.c.bf16 %v480_v7, %v478_v6  ;;  %v482_v12 = vld [vmem:[#allocation5 + $0x48] sm:$0xff]  ;;  %4736 = vmatprep.subr.bf16.mxu0 %v4735_v4  ;;  %v484_v13 = vld [vmem:[#allocation5 + $0x58] sm:$0xff]  ;;  %v4741_v14 = vpack.c.bf16 %v479_v11, %v477_v10  ;;  %v481_v16 = vld [vmem:[#allocation5 + $0x40] sm:$0xff]  ;;  %s6203_s13 = sld [smem:[#allocation18_spill]]  ;;  %s6205_s17 = sld [smem:[#allocation20_spill]] }
  0xa4   : > { %4738 = vmatpush1.bf16.msra.mxu0 %v4737_v8  ;;  %v4743_v15 = vpack.c.bf16 %v484_v13, %v482_v12  ;;  %v483_v17 = vld [vmem:[#allocation5 + $0x50] sm:$0xff]  ;;  %v486_v18 = vld [vmem:[#allocation5 + $0x68] sm:$0xff]  ;;  %v488_v19 = vld [vmem:[#allocation5 + $0x78] sm:$0xff]  ;;  %s6090_s15 = scalar_lea.vmem [#allocation11], %s4252_s9  ;;  %s4358_s9 = sshll.u32 %s5325_s21, 10 }
  0xa5   : > { %4740 = vmatprep.subr.bf16.mxu0 %v4739_v9  ;;  %v4745_v20 = vpack.c.bf16 %v483_v17, %v481_v16  ;;  %v4747_v21 = vpack.c.bf16 %v488_v19, %v486_v18  ;;  %v485_v22 = vld [vmem:[#allocation5 + $0x60] sm:$0xff]  ;;  %v487_v23 = vld [vmem:[#allocation5 + $0x70] sm:$0xff]  ;;  %v466_v26 = vld [vmem:[%s5516_s29 + $0x8] sm:$0xff]  ;;  %s4130_s16 = sshll.u32 %s6090_s15, 4  ;;  %s6206_s12 = sld [smem:[#allocation21_spill]]  ;;  %s6117_s16 = int_to_ptr.vmem [resolvable:$true] %s4130_s16 }
  0xa6   : > { %v4749_v24 = vpack.c.bf16 %v487_v23, %v485_v22  ;;  %v465_v25 = vld [vmem:[%s5516_s29] sm:$0xff]  ;;  %v467_v27 = vld [vmem:[%s5516_s29 + $0x10] sm:$0xff]  ;;  %v468_v28 = vld [vmem:[%s5516_s29 + $0x18] sm:$0xff]  ;;  %s4117_s21 = scalar_lea.sflag [#allocation4], %s5510_s28  ;;  %s5151_s27 = scalar_lea.vmem %s6117_s16, 1024 }
  0xa7   : > { %v469_v29 = vld [vmem:[%s5516_s29 + $0x20] sm:$0xff]  ;;  %v470_v30 = vld [vmem:[%s5516_s29 + $0x28] sm:$0xff]  ;;  %v471_v31 = vld [vmem:[%s5516_s29 + $0x30] sm:$0xff]  ;;  %p5152_p8 = scmp.ne.s32.totalorder %s6117_s16, %s5151_s27 }
  0xa8   : > { %4742 = vmatpush1.bf16.msra.mxu0 %v4741_v14  ;;  %v472_v32 = vld [vmem:[%s5516_s29 + $0x38] sm:$0xff] }
  0xa9   : > { %4744 = vmatprep.subr.bf16.mxu0 %v4743_v15  ;;  %p5153_p10 = pnand %p5152_p8, %p5455_p6 }
  0xab   : > { %s6115_s26 = scalar_lea.hbm %s6206_s12, %s4358_s9  ;;  %p5154_p12 = pneg %p5153_p10 }
  0xac   : > { %4746 = vmatpush1.bf16.msra.mxu0 %v4745_v20 }
  0xad   : > { %4748 = vmatprep.subr.bf16.mxu0 %v4747_v21 }
  0xb0   : > { %4750 = vmatpush1.bf16.msra.mxu0 %v4749_v24 }
  0xb1   : > { %4544 = vmatprep.subr.mxu0 %v5236_v0 }
  0xb3   : > { %4258 = vmatmul.mubr.msk.f32.vlgmr.msra.gmra.mrb[0].mxu0 %vm489_vm0, %v465_v25 }
  0xb4   : > { %584 = vmatprep.mubr.f32.mxu0 %v5236_v0 }
  0xb7   : > { %4259 = vmatmul.mubr.msk.f32.gmra.mrb[2].mxu0 %vm489_vm0, %v466_v26 }
  0xb8   : > { %590 = vmatprep.mubr.f32.mxu0 %v5236_v0 }
  0xbb   : > { %4260 = vmatmul.mubr.msk.f32.gmra.mrb[4].mxu0 %vm489_vm0, %v467_v27 }
  0xbc   : > { %596 = vmatprep.mubr.f32.mxu0 %v5236_v0 }
  0xbf   : > { %4261 = vmatmul.mubr.msk.f32.gmra.mrb[6].mxu0 %vm489_vm0, %v468_v28 }
  0xc0   : > { %602 = vmatprep.mubr.f32.mxu0 %v5236_v0 }
  0xc3   : > { %4262 = vmatmul.mubr.msk.f32.gmra.mrb[8].mxu0 %vm489_vm0, %v469_v29 }
  0xc4   : > { %608 = vmatprep.mubr.f32.mxu0 %v5236_v0 }
  0xc7   : > { %4263 = vmatmul.mubr.msk.f32.gmra.mrb[10].mxu0 %vm489_vm0, %v470_v30 }
  0xc8   : > { %614 = vmatprep.mubr.f32.mxu0 %v5236_v0 }
  0xcb   : > { %4264 = vmatmul.mubr.msk.f32.gmra.mrb[12].mxu0 %vm489_vm0, %v471_v31 }
  0xcc   : > { %620 = vmatprep.mubr.f32.mxu0 %v5236_v0 }
  0xcf   : > { %4265 = vmatmul.mubr.msk.f32.gmra.mrb[14].mxu0 %vm489_vm0, %v472_v32 }
  0xd0   : > { %4546 = vmatprep.mubr.msk.f32.mxu0 %vm5237_vm1, %v5236_v0 }
 0x186   : > { %v580_v33 = vpop.f32.mrb[0].mxu0 }
 0x187   : > { %628 = vrot.lane.b32.xlu0 %v580_v33, %s5238_s23  ;;  %v5560_v34 = vpop.f32.mrb[1].mxu0 }
 0x18a   : > { %v586_v35 = vpop.f32.mrb[2].mxu0 }
 0x18b   : > { %706 = vrot.lane.b32.xlu0 %v586_v35, %s5238_s23  ;;  %v5562_v36 = vpop.f32.mrb[3].mxu0 }
 0x18e   : > { %v5564_v37 = vpop.f32.mrb[4].mxu0 }
 0x18f   : > { %783 = vrot.lane.b32.xlu1 %v5564_v37, %s5238_s23  ;;  %v5567_v38 = vpop.f32.mrb[5].mxu0 }
 0x192   : > { %v5569_v39 = vpop.f32.mrb[6].mxu0 }
 0x193   : > { %860 = vrot.lane.b32.xlu1 %v5569_v39, %s5238_s23  ;;  %v5572_v40 = vpop.f32.mrb[7].mxu0 }
 0x196   : > { %v5574_v41 = vpop.f32.mrb[8].mxu0 }
 0x197   : > { %937 = vrot.lane.b32.xlu0 %v5574_v41, %s5238_s23  ;;  %v5577_v42 = vpop.f32.mrb[9].mxu0 }
 0x19a   : > { %v5579_v43 = vpop.f32.mrb[10].mxu0 }
 0x19b   : > { %1014 = vrot.lane.b32.xlu1 %v5579_v43, %s5238_s23  ;;  %v5582_v44 = vpop.f32.mrb[11].mxu0 }
 0x19c   : > { %4545 = vmatpush3.msra.mxu0 %v5582_v44 }
 0x19d   : > { %4554 = vmatprep.subr.mxu0 %v5236_v0 }
 0x19e   : > { %v5586_v45 = vpop.f32.mrb[12].mxu0 }
 0x19f   : > { %1091 = vrot.lane.b32.xlu0 %v5586_v45, %s5238_s23  ;;  %v5589_v46 = vpop.f32.mrb[13].mxu0 }
 0x1a2   : > { %v5591_v47 = vpop.f32.mrb[14].mxu0 }
 0x1a3   : > { %2001 = vrot.lane.b32.xlu0 %v586_v35, %s5239_s25  ;;  %1168 = vrot.lane.b32.xlu1 %v5591_v47, %s5238_s23  ;;  %v5595_v48 = vpop.f32.mrb[15].mxu0  ;;  %s6204_s23 = sld [smem:[#allocation19_spill]] }
 0x1a7   : > { %1923 = vrot.lane.b32.xlu1 %v580_v33, %s5239_s25 }
 0x1ab   : > { %1921 = vrot.lane.b32.xlu1 %v580_v33, %s5240_s10 }
 0x1af   : > { %1999 = vrot.lane.b32.xlu1 %v586_v35, %s5240_s10 }
 0x1f9   : > { %v629_v49 = vpop.permute.xlu0 %628 }
 0x1fa   : > { %4480 = vmatpush3.xpose.msk.msra.mxu1 %vm630_vm2, %v629_v49 }
 0x1fb   : > { %4484 = vmatprep.subr.mxu1 %v5236_v0 }
 0x1fd   : > { %4482 = vmatmul.mubr.msk.f32.vlgmr.msra.gmra.mrb[0].mxu1 %vm630_vm2, %v580_v33  ;;  %v707_v50 = vpop.permute.xlu0 %706 }
 0x1fe   : > { %4485 = vmatpush3.xpose.msk.msra.mxu1 %vm630_vm2, %v707_v50  ;;  %4486 = vmatprep.mubr.msk.f32.mxu1 %vm5237_vm1, %v5236_v0 }
 0x1ff   : > { %4489 = vmatprep.subr.mxu1 %v5236_v0 }
 0x201   : > { %4487 = vmatmul.mubr.msk.f32.vlgmr.msra.gmra.mrb[2].mxu1 %vm630_vm2, %v586_v35  ;;  %v784_v51 = vpop.permute.xlu1 %783 }
 0x202   : > { %4490 = vmatpush3.xpose.msk.msra.mxu1 %vm630_vm2, %v784_v51  ;;  %4491 = vmatprep.mubr.msk.f32.mxu1 %vm5237_vm1, %v5236_v0 }
 0x203   : > { %4494 = vmatprep.subr.mxu1 %v5236_v0 }
 0x205   : > { %4492 = vmatmul.mubr.msk.f32.vlgmr.msra.gmra.mrb[4].mxu1 %vm630_vm2, %v5564_v37  ;;  %v861_v52 = vpop.permute.xlu1 %860 }
 0x206   : > { %4495 = vmatpush3.xpose.msk.msra.mxu1 %vm630_vm2, %v861_v52  ;;  %4496 = vmatprep.mubr.msk.f32.mxu1 %vm5237_vm1, %v5236_v0 }
 0x207   : > { %4499 = vmatprep.subr.mxu1 %v5236_v0 }
 0x209   : > { %4497 = vmatmul.mubr.msk.f32.vlgmr.msra.gmra.mrb[6].mxu1 %vm630_vm2, %v5569_v39  ;;  %v938_v53 = vpop.permute.xlu0 %937 }
 0x20a   : > { %4500 = vmatpush3.xpose.msk.msra.mxu1 %vm630_vm2, %v938_v53  ;;  %4501 = vmatprep.mubr.msk.f32.mxu1 %vm5237_vm1, %v5236_v0 }
 0x20b   : > { %4504 = vmatprep.subr.mxu1 %v5236_v0 }
 0x20d   : > { %4502 = vmatmul.mubr.msk.f32.vlgmr.msra.gmra.mrb[8].mxu1 %vm630_vm2, %v5574_v41  ;;  %v1015_v54 = vpop.permute.xlu1 %1014 }
 0x20e   : > { %4505 = vmatpush3.xpose.msk.msra.mxu1 %vm630_vm2, %v1015_v54  ;;  %4506 = vmatprep.mubr.msk.f32.mxu1 %vm5237_vm1, %v5236_v0 }
 0x20f   : > { %4509 = vmatprep.subr.mxu1 %v5236_v0 }
 0x211   : > { %4507 = vmatmul.mubr.msk.f32.vlgmr.msra.gmra.mrb[10].mxu1 %vm630_vm2, %v5579_v43  ;;  %v1092_v55 = vpop.permute.xlu0 %1091 }
 0x212   : > { %4510 = vmatpush3.xpose.msk.msra.mxu1 %vm630_vm2, %v1092_v55  ;;  %4511 = vmatprep.mubr.msk.f32.mxu1 %vm5237_vm1, %v5236_v0 }
 0x213   : > { %4514 = vmatprep.subr.mxu1 %v5236_v0 }
 0x215   : > { %4512 = vmatmul.mubr.msk.f32.vlgmr.msra.gmra.mrb[12].mxu1 %vm630_vm2, %v5586_v45  ;;  %v1169_v56 = vpop.permute.xlu1 %1168  ;;  %v5664_v20 = vpop.permute.xlu0 %2001 }
 0x216   : > { %4515 = vmatpush3.xpose.msk.msra.mxu1 %vm630_vm2, %v1169_v56  ;;  %4516 = vmatprep.mubr.msk.f32.mxu1 %vm5237_vm1, %v5236_v0 }
 0x217   : > { %4519 = vmatprep.subr.mxu1 %v5236_v0 }
 0x219   : > { %4517 = vmatmul.mubr.msk.f32.vlgmr.msra.gmra.mrb[14].mxu1 %vm630_vm2, %v5591_v47  ;;  %v5660_v18 = vpop.permute.xlu1 %1923 }
 0x21a   : > { %4520 = vmatpush3.msra.mxu1 %v5560_v34  ;;  %4521 = vmatprep.mubr.msk.f32.mxu1 %vm5237_vm1, %v5236_v0 }
 0x21b   : > { %4524 = vmatprep.subr.mxu1 %v5236_v0 }
 0x21d   : > { %v5662_v19 = vpop.permute.xlu1 %1921 }
 0x221   : > { %v5666_v21 = vpop.permute.xlu1 %1999 }
 0x2d0   : > { %v701_v57 = vpop.f32.mrb[0].mxu1 }
 0x2d1   : > { %v4483_v58 = vpop.f32.mrb[1].mxu1  ;;  %v1245_v59 = vsel %vm1244_vm3, %v701_v57, -inf }
 0x2d2   : > { %1246 = vmax.xlane.f32.xlu0 %v1245_v59 }
 0x2d4   : > { %v778_v60 = vpop.f32.mrb[2].mxu1 }
 0x2d5   : > { %v4488_v61 = vpop.f32.mrb[3].mxu1  ;;  %v1248_v62 = vsel %vm1244_vm3, %v778_v60, -inf }
 0x2d6   : > { %1249 = vmax.xlane.f32.xlu1 %v1248_v62 }
 0x2d8   : > { %v855_v63 = vpop.f32.mrb[4].mxu1 }
 0x2d9   : > { %v4493_v1 = vpop.f32.mrb[5].mxu1  ;;  %v1251_v2 = vsel %vm1244_vm3, %v855_v63, -inf }
 0x2da   : > { %1252 = vmax.xlane.f32.xlu0 %v1251_v2 }
 0x2dc   : > { %v932_v3 = vpop.f32.mrb[6].mxu1 }
 0x2dd   : > { %v4498_v4 = vpop.f32.mrb[7].mxu1  ;;  %v1254_v5 = vsel %vm1244_vm3, %v932_v3, -inf }
 0x2de   : > { %1255 = vmax.xlane.f32.xlu0 %v1254_v5 }
 0x2e0   : > { %v1009_v6 = vpop.f32.mrb[8].mxu1 }
 0x2e1   : > { %v4503_v7 = vpop.f32.mrb[9].mxu1  ;;  %v1257_v8 = vsel %vm1244_vm3, %v1009_v6, -inf }
 0x2e2   : > { %1258 = vmax.xlane.f32.xlu1 %v1257_v8 }
 0x2e4   : > { %v1086_v9 = vpop.f32.mrb[10].mxu1 }
 0x2e5   : > { %v4508_v10 = vpop.f32.mrb[11].mxu1  ;;  %v1260_v11 = vsel %vm1244_vm3, %v1086_v9, -inf }
 0x2e6   : > { %1261 = vmax.xlane.f32.xlu0 %v1260_v11 }
 0x2e8   : > { %v1163_v12 = vpop.f32.mrb[12].mxu1 }
 0x2e9   : > { %v4513_v13 = vpop.f32.mrb[13].mxu1  ;;  %v1263_v14 = vsel %vm1244_vm3, %v1163_v12, -inf }
 0x2ea   : > { %1264 = vmax.xlane.f32.xlu1 %v1263_v14 }
 0x2ec   : > { %v1240_v15 = vpop.f32.mrb[14].mxu1 }
 0x2ed   : > { %v4518_v16 = vpop.f32.mrb[15].mxu1  ;;  %v1266_v17 = vsel %vm1244_vm3, %v1240_v15, -inf }
 0x2ee   : > { %1267 = vmax.xlane.f32.xlu0 %v1266_v17 }
 0x2fb   : > { %2157 = vrot.lane.b32.xlu1 %v5569_v39, %s5239_s25 }
 0x304   : > { %2079 = vrot.lane.b32.xlu0 %v5564_v37, %s5239_s25 }
 0x35f   : > { %v1247_v22 = vpop.xlane.xlu0 %1246 }
 0x360   : > { %v1269_v23 = vsub.f32 %v701_v57, %v1247_v22 }
 0x362   : > { %v1277_v24 = vmul.f32 1.442695, %v1269_v23 }
 0x363   : > { %v1250_v25 = vpop.xlane.xlu1 %1249 }
 0x364   : > { %4905 = vpow2.f32 %v1277_v24  ;;  %v1270_v26 = vsub.f32 %v778_v60, %v1250_v25 }
 0x366   : > { %v1279_v27 = vmul.f32 1.442695, %v1270_v26 }
 0x367   : > { %v1253_v28 = vpop.xlane.xlu0 %1252 }
 0x368   : > { %4907 = vpow2.f32 %v1279_v27  ;;  %v1271_v29 = vsub.f32 %v855_v63, %v1253_v28 }
 0x36a   : > { %v1281_v30 = vmul.f32 1.442695, %v1271_v29 }
 0x36b   : > { %v1256_v31 = vpop.xlane.xlu0 %1255 }
 0x36c   : > { %4909 = vpow2.f32 %v1281_v30  ;;  %v1272_v32 = vsub.f32 %v932_v3, %v1256_v31 }
 0x36e   : > { %v4906_v33 = vpop.eup %4905  ;;  %v1283_v35 = vmul.f32 1.442695, %v1272_v32 }
 0x36f   : > { %v1259_v49 = vpop.xlane.xlu1 %1258  ;;  %v1293_v50 = vsel %vm1244_vm3, %v4906_v33, 0.0 }
 0x370   : > { %4911 = vpow2.f32 %v1283_v35  ;;  %v1273_v51 = vsub.f32 %v1009_v6, %v1259_v49  ;;  %1294 = vadd.xlane.f32.xlu1 %v1293_v50 }
 0x372   : > { %v4908_v52 = vpop.eup %4907  ;;  %v1285_v53 = vmul.f32 1.442695, %v1273_v51 }
 0x373   : > { %v1262_v54 = vpop.xlane.xlu0 %1261  ;;  %v1296_v55 = vsel %vm1244_vm3, %v4908_v52, 0.0 }
 0x374   : > { %4913 = vpow2.f32 %v1285_v53  ;;  %v1274_v56 = vsub.f32 %v1086_v9, %v1262_v54  ;;  %1297 = vadd.xlane.f32.xlu0 %v1296_v55 }
 0x376   : > { %v4910_v57 = vpop.eup %4909  ;;  %v1287_v58 = vmul.f32 1.442695, %v1274_v56 }
 0x377   : > { %v1299_v59 = vsel %vm1244_vm3, %v4910_v57, 0.0  ;;  %v1265_v3 = vpop.xlane.xlu1 %1264 }
 0x378   : > { %4915 = vpow2.f32 %v1287_v58  ;;  %1300 = vadd.xlane.f32.xlu1 %v1299_v59  ;;  %v1275_v4 = vsub.f32 %v1163_v12, %v1265_v3 }
 0x37a   : > { %v5671_v60 = vpop.eup %4911  ;;  %v1289_v6 = vmul.f32 1.442695, %v1275_v4 }
 0x37b   : > { %v1302_v61 = vsel %vm1244_vm3, %v5671_v60, 0.0  ;;  %v1268_v5 = vpop.xlane.xlu0 %1267 }
 0x37c   : > { %1303 = vadd.xlane.f32.xlu0 %v1302_v61  ;;  %v1276_v7 = vsub.f32 %v1240_v15, %v1268_v5  ;;  %4917 = vpow2.f32 %v1289_v6 }
 0x37e   : > { %v5675_v62 = vpop.eup %4913  ;;  %v1291_v8 = vmul.f32 1.442695, %v1276_v7 }
 0x37f   : > { %v1305_v63 = vsel %vm1244_vm3, %v5675_v62, 0.0 }
 0x380   : > { %1306 = vadd.xlane.f32.xlu1 %v1305_v63  ;;  %4919 = vpow2.f32 %v1291_v8 }
 0x382   : > { %v5679_v1 = vpop.eup %4915 }
 0x383   : > { %v1308_v2 = vsel %vm1244_vm3, %v5679_v1, 0.0 }
 0x384   : > { %1309 = vadd.xlane.f32.xlu0 %v1308_v2 }
 0x386   : > { %v5687_v9 = vpop.eup %4917 }
 0x387   : > { %v1311_v10 = vsel %vm1244_vm3, %v5687_v9, 0.0 }
 0x38a   : > { %v5691_v11 = vpop.eup %4919 }
 0x391   : > { %2155 = vrot.lane.b32.xlu1 %v5569_v39, %s5240_s10  ;;  %v1314_v39 = vsel %vm1244_vm3, %v5691_v11, 0.0 }
 0x39a   : > { %2077 = vrot.lane.b32.xlu0 %v5564_v37, %s5240_s10  ;;  %v5711_v37 = vpop.permute.xlu1 %2157 }
 0x3b5   : > { %1312 = vadd.xlane.f32.xlu1 %v1311_v10 }
 0x3b9   : > { %1315 = vadd.xlane.f32.xlu0 %v1314_v39 }
 0x3c6   : > { %2313 = vrot.lane.b32.xlu1 %v5579_v43, %s5239_s25 }
 0x3ca   : > { %2311 = vrot.lane.b32.xlu1 %v5579_v43, %s5240_s10  ;;  %v5713_v43 = vpop.permute.xlu0 %2079 }
 0x3ce   : > { %2469 = vrot.lane.b32.xlu1 %v5591_v47, %s5239_s25 }
 0x3cf   : > { %2235 = vrot.lane.b32.xlu0 %v5574_v41, %s5239_s25 }
 0x3d2   : > { %2467 = vrot.lane.b32.xlu1 %v5591_v47, %s5240_s10 }
 0x3d3   : > { %2233 = vrot.lane.b32.xlu0 %v5574_v41, %s5240_s10 }
 0x3d7   : > { %2391 = vrot.lane.b32.xlu0 %v5586_v45, %s5239_s25 }
 0x3db   : > { %2389 = vrot.lane.b32.xlu0 %v5586_v45, %s5240_s10 }
 0x3fd   : > { %v1295_v12 = vpop.xlane.xlu1 %1294 }
 0x3fe   : > { %4921 = vrcp.f32 %v1295_v12 }
 0x401   : > { %v1298_v13 = vpop.xlane.xlu0 %1297 }
 0x402   : > { %4923 = vrcp.f32 %v1298_v13 }
 0x405   : > { %v1301_v14 = vpop.xlane.xlu1 %1300 }
 0x406   : > { %4925 = vrcp.f32 %v1301_v14 }
 0x408   : > { %v4922_v47 = vpop.eup %4921 }
 0x409   : > { %v1325_v15 = vmul.f32 %v4922_v47, %v4906_v33  ;;  %v1304_v16 = vpop.xlane.xlu0 %1303 }
 0x40a   : > { %4927 = vrcp.f32 %v1304_v16 }
 0x40b   : > { %4522 = vmatmul.mubr.msk.f32.vlgmr.msra.gmra.mrb[16].mxu1 %vm1244_vm3, %v1325_v15 }
 0x40c   : > { %v4924_v41 = vpop.eup %4923  ;;  %4525 = vmatpush3.msra.mxu1 %v5562_v36  ;;  %4526 = vmatprep.mubr.msk.f32.mxu1 %vm5237_vm1, %v5236_v0 }
 0x40d   : > { %v1326_v45 = vmul.f32 %v4924_v41, %v4908_v52  ;;  %v1307_v17 = vpop.xlane.xlu1 %1306  ;;  %4529 = vmatprep.subr.mxu1 %v5236_v0 }
 0x40e   : > { %4929 = vrcp.f32 %v1307_v17 }
 0x40f   : > { %4527 = vmatmul.mubr.msk.f32.vlgmr.msra.gmra.mrb[18].mxu1 %vm1244_vm3, %v1326_v45 }
 0x410   : > { %v4926_v22 = vpop.eup %4925  ;;  %4530 = vmatpush3.msra.mxu1 %v5567_v38  ;;  %4531 = vmatprep.mubr.msk.f32.mxu1 %vm5237_vm1, %v5236_v0 }
 0x411   : > { %v1327_v23 = vmul.f32 %v4926_v22, %v4910_v57  ;;  %v1310_v24 = vpop.xlane.xlu0 %1309  ;;  %4534 = vmatprep.subr.mxu1 %v5236_v0  ;;  %v2156_v31 = vpop.permute.xlu1 %2155 }
 0x412   : > { %4931 = vrcp.f32 %v1310_v24 }
 0x413   : > { %4532 = vmatmul.mubr.msk.f32.vlgmr.msra.gmra.mrb[20].mxu1 %vm1244_vm3, %v1327_v23 }
 0x414   : > { %v4928_v25 = vpop.eup %4927  ;;  %4535 = vmatpush3.msra.mxu1 %v5572_v40  ;;  %4536 = vmatprep.mubr.msk.f32.mxu1 %vm5237_vm1, %v5236_v0 }
 0x415   : > { %v1328_v26 = vmul.f32 %v4928_v25, %v5671_v60  ;;  %4539 = vmatprep.subr.mxu1 %v5236_v0  ;;  %v2078_v32 = vpop.permute.xlu0 %2077 }
 0x417   : > { %4537 = vmatmul.mubr.msk.f32.vlgmr.msra.gmra.mrb[22].mxu1 %vm1244_vm3, %v1328_v26 }
 0x418   : > { %v4930_v27 = vpop.eup %4929  ;;  %4540 = vmatpush3.msra.mxu1 %v5577_v42  ;;  %4541 = vmatprep.mubr.msk.f32.mxu1 %vm5237_vm1, %v5236_v0 }
 0x419   : > { %v1329_v28 = vmul.f32 %v4930_v27, %v5675_v62  ;;  %4549 = vmatprep.subr.mxu1 %v5236_v0 }
 0x41b   : > { %4542 = vmatmul.mubr.msk.f32.vlgmr.msra.gmra.mrb[24].mxu1 %vm1244_vm3, %v1329_v28 }
 0x41c   : > { %v4932_v29 = vpop.eup %4931  ;;  %4550 = vmatpush3.msra.mxu1 %v5589_v46  ;;  %4551 = vmatprep.mubr.msk.f32.mxu1 %vm5237_vm1, %v5236_v0 }
 0x41d   : > { %v1330_v30 = vmul.f32 %v4932_v29, %v5679_v1  ;;  %4559 = vmatprep.subr.mxu1 %v5236_v0 }
 0x41f   : > { %4547 = vmatmul.mubr.msk.f32.vlgmr.msra.gmra.mrb[16].mxu0 %vm1244_vm3, %v1330_v30 }
 0x420   : > { %4555 = vmatpush3.msra.mxu0 %v5595_v48  ;;  %4556 = vmatprep.mubr.msk.f32.mxu0 %vm5237_vm1, %v5236_v0 }
 0x421   : > { %4564 = vmatprep.subr.mxu0 %v5236_v0 }
 0x442   : > { %v1313_v33 = vpop.xlane.xlu1 %1312 }
 0x443   : > { %4933 = vrcp.f32 %v1313_v33 }
 0x446   : > { %v1316_v35 = vpop.xlane.xlu0 %1315  ;;  %v2314_v53 = vpop.permute.xlu1 %2313 }
 0x447   : > { %4935 = vrcp.f32 %v1316_v35 }
 0x44a   : > { %v2236_v50 = vpop.permute.xlu0 %2235 }
 0x44d   : > { %v4934_v49 = vpop.eup %4933 }
 0x44e   : > { %v1331_v51 = vmul.f32 %v4934_v49, %v5687_v9  ;;  %v2234_v55 = vpop.permute.xlu0 %2233 }
 0x450   : > { %4552 = vmatmul.mubr.msk.f32.vlgmr.msra.gmra.mrb[26].mxu1 %vm1244_vm3, %v1331_v51 }
 0x451   : > { %v4936_v52 = vpop.eup %4935  ;;  %4560 = vmatpush3.xpose.msk.msra.mxu1 %vm630_vm2, %v5660_v18  ;;  %4561 = vmatprep.mubr.msk.f32.mxu1 %vm5237_vm1, %v5236_v0  ;;  %v2312_v18 = vpop.permute.xlu1 %2311 }
 0x452   : > { %v1332_v54 = vmul.f32 %v4936_v52, %v5691_v11  ;;  %4569 = vmatprep.subr.mxu1 %v5236_v0 }
 0x454   : > { %4557 = vmatmul.mubr.msk.f32.vlgmr.msra.gmra.mrb[18].mxu0 %vm1244_vm3, %v1332_v54  ;;  %4562 = vmatmul.mubr.msk.f32.vlgmr.msra.gmra.mrb[28].mxu1 %vm630_vm2, %v5662_v19  ;;  %v2392_v19 = vpop.permute.xlu0 %2391 }
 0x455   : > { %4565 = vmatpush3.xpose.msk.msra.mxu0 %vm630_vm2, %v5664_v20  ;;  %4570 = vmatpush3.xpose.msk.msra.mxu1 %vm630_vm2, %v5713_v43  ;;  %v2470_v20 = vpop.permute.xlu1 %2469 }
 0x456   : > { %4566 = vmatprep.mubr.msk.f32.mxu0 %vm5237_vm1, %v5236_v0  ;;  %4571 = vmatprep.mubr.msk.f32.mxu1 %vm5237_vm1, %v5236_v0 }
 0x457   : > { %4574 = vmatprep.subr.mxu0 %v5236_v0  ;;  %4579 = vmatprep.subr.mxu1 %v5236_v0 }
 0x458   : > { %4567 = vmatmul.mubr.msk.f32.vlgmr.msra.gmra.mrb[20].mxu0 %vm630_vm2, %v5666_v21  ;;  %4572 = vmatmul.mubr.msk.f32.vlgmr.msra.gmra.mrb[30].mxu1 %vm630_vm2, %v2078_v32  ;;  %v2390_v21 = vpop.permute.xlu0 %2389 }
 0x459   : > { %4575 = vmatpush3.xpose.msk.msra.mxu0 %vm630_vm2, %v5711_v37  ;;  %4580 = vmatpush3.xpose.msk.msra.mxu1 %vm630_vm2, %v2236_v50  ;;  %v2468_v56 = vpop.permute.xlu1 %2467 }
 0x45a   : > { %4576 = vmatprep.mubr.msk.f32.mxu0 %vm5237_vm1, %v5236_v0  ;;  %4581 = vmatprep.mubr.msk.f32.mxu1 %vm5237_vm1, %v5236_v0 }
 0x45b   : > { %4584 = vmatprep.subr.mxu0 %v5236_v0  ;;  %4589 = vmatprep.subr.mxu1 %v5236_v0 }
 0x45c   : > { %4577 = vmatmul.mubr.msk.f32.vlgmr.msra.gmra.mrb[22].mxu0 %vm630_vm2, %v2156_v31  ;;  %4582 = vmatmul.mubr.msk.f32.vlgmr.msra.gmra.mrb[32].mxu1 %vm630_vm2, %v2234_v55 }
 0x45d   : > { %4585 = vmatpush3.xpose.msk.msra.mxu0 %vm630_vm2, %v2314_v53  ;;  %4590 = vmatpush3.xpose.msk.msra.mxu1 %vm630_vm2, %v2392_v19 }
 0x45e   : > { %4586 = vmatprep.mubr.msk.f32.mxu0 %vm5237_vm1, %v5236_v0  ;;  %4591 = vmatprep.mubr.msk.f32.mxu1 %vm5237_vm1, %v5236_v0 }
 0x45f   : > { %4594 = vmatprep.subr.mxu0 %v5236_v0  ;;  %4599 = vmatprep.subr.mxu1 %v5236_v0 }
 0x460   : > { %4587 = vmatmul.mubr.msk.f32.vlgmr.msra.gmra.mrb[24].mxu0 %vm630_vm2, %v2312_v18  ;;  %4592 = vmatmul.mubr.msk.f32.vlgmr.msra.gmra.mrb[34].mxu1 %vm630_vm2, %v2390_v21 }
 0x461   : > { %4595 = vmatpush3.xpose.msk.msra.mxu0 %vm630_vm2, %v2470_v20  ;;  %4596 = vmatprep.mubr.msk.f32.mxu0 %vm5237_vm1, %v5236_v0 }
 0x462   : > { %4604 = vmatprep.subr.mxu0 %v5236_v0  ;;  %4601 = vmatprep.mubr.msk.f32.mxu1 %vm5237_vm1, %v5236_v0 }
 0x464   : > { %4597 = vmatmul.mubr.msk.f32.vlgmr.msra.gmra.mrb[26].mxu0 %vm630_vm2, %v2468_v56 }
 0x465   : > { %4606 = vmatprep.mubr.msk.f32.mxu0 %vm5237_vm1, %v5236_v0 }
 0x4de   : > { %v5802_v57 = vpop.f32.mrb[16].mxu1 }
 0x4df   : > { %v4523_v58 = vpop.f32.mrb[17].mxu1 }
 0x4e2   : > { %v5804_v59 = vpop.f32.mrb[18].mxu1 }
 0x4e3   : > { %v4528_v60 = vpop.f32.mrb[19].mxu1 }
 0x4e6   : > { %v5806_v61 = vpop.f32.mrb[20].mxu1 }
 0x4e7   : > { %v4533_v62 = vpop.f32.mrb[21].mxu1 }
 0x4ea   : > { %v5808_v63 = vpop.f32.mrb[22].mxu1 }
 0x4eb   : > { %v4538_v1 = vpop.f32.mrb[23].mxu1 }
 0x4ee   : > { %v5810_v2 = vpop.f32.mrb[24].mxu1 }
 0x4ef   : > { %v4543_v3 = vpop.f32.mrb[25].mxu1 }
 0x4f2   : > { %v5812_v4 = vpop.f32.mrb[16].mxu0 }
 0x4f3   : > { %v4548_v5 = vpop.f32.mrb[17].mxu0 }
 0x523   : > { %v5814_v6 = vpop.f32.mrb[26].mxu1 }
 0x524   : > { %v4553_v7 = vpop.f32.mrb[27].mxu1 }
 0x527   : > { %v5816_v8 = vpop.f32.mrb[18].mxu0  ;;  %v1995_v9 = vpop.f32.mrb[28].mxu1 }
 0x528   : > { %v4558_v10 = vpop.f32.mrb[19].mxu0  ;;  %v4563_v11 = vpop.f32.mrb[29].mxu1  ;;  %v2545_v39 = vsel %vm1244_vm3, %v1995_v9, -inf }
 0x529   : > { %2546 = vmax.xlane.f32.xlu0 %v2545_v39 }
 0x52b   : > { %v2073_v37 = vpop.f32.mrb[20].mxu0  ;;  %v2151_v43 = vpop.f32.mrb[30].mxu1 }
 0x52c   : > { %v4568_v12 = vpop.f32.mrb[21].mxu0  ;;  %v4573_v13 = vpop.f32.mrb[31].mxu1  ;;  %v2551_v14 = vsel %vm1244_vm3, %v2151_v43, -inf  ;;  %v2548_v47 = vsel %vm1244_vm3, %v2073_v37, -inf }
 0x52d   : > { %2552 = vmax.xlane.f32.xlu0 %v2551_v14  ;;  %2549 = vmax.xlane.f32.xlu1 %v2548_v47 }
 0x52f   : > { %v2229_v15 = vpop.f32.mrb[22].mxu0  ;;  %v2307_v16 = vpop.f32.mrb[32].mxu1 }
 0x530   : > { %v4578_v41 = vpop.f32.mrb[23].mxu0  ;;  %v4583_v45 = vpop.f32.mrb[33].mxu1  ;;  %v2557_v17 = vsel %vm1244_vm3, %v2307_v16, -inf  ;;  %v2554_v22 = vsel %vm1244_vm3, %v2229_v15, -inf }
 0x531   : > { %2558 = vmax.xlane.f32.xlu1 %v2557_v17  ;;  %2555 = vmax.xlane.f32.xlu0 %v2554_v22 }
 0x533   : > { %v2385_v23 = vpop.f32.mrb[24].mxu0  ;;  %v2463_v24 = vpop.f32.mrb[34].mxu1 }
 0x534   : > { %v4588_v25 = vpop.f32.mrb[25].mxu0  ;;  %v4593_v26 = vpop.f32.mrb[35].mxu1  ;;  %v2563_v27 = vsel %vm1244_vm3, %v2463_v24, -inf  ;;  %v2560_v28 = vsel %vm1244_vm3, %v2385_v23, -inf }
 0x535   : > { %2564 = vmax.xlane.f32.xlu1 %v2563_v27  ;;  %2561 = vmax.xlane.f32.xlu0 %v2560_v28 }
 0x537   : > { %v2541_v29 = vpop.f32.mrb[26].mxu0 }
 0x538   : > { %v4598_v30 = vpop.f32.mrb[27].mxu0  ;;  %v2566_v31 = vsel %vm1244_vm3, %v2541_v29, -inf }
 0x539   : > { %2567 = vmax.xlane.f32.xlu0 %v2566_v31 }
 0x546   : > { %2634 = vrot.lane.b32.xlu1 %v5560_v34, %s5240_s10 }
 0x54a   : > { %2788 = vrot.lane.b32.xlu1 %v5567_v38, %s5240_s10 }
 0x54e   : > { %2865 = vrot.lane.b32.xlu1 %v5572_v40, %s5240_s10 }
 0x54f   : > { %2711 = vrot.lane.b32.xlu0 %v5562_v36, %s5240_s10 }
 0x552   : > { %3019 = vrot.lane.b32.xlu1 %v5582_v44, %s5240_s10 }
 0x553   : > { %2942 = vrot.lane.b32.xlu0 %v5577_v42, %s5240_s10 }
 0x5b6   : > { %v2547_v32 = vpop.xlane.xlu0 %2546 }
 0x5b7   : > { %v2569_v33 = vsub.f32 %v1995_v9, %v2547_v32 }
 0x5b9   : > { %v2577_v35 = vmul.f32 1.442695, %v2569_v33 }
 0x5ba   : > { %v2553_v49 = vpop.xlane.xlu0 %2552  ;;  %v2550_v34 = vpop.xlane.xlu1 %2549 }
 0x5bb   : > { %4937 = vpow2.f32 %v2577_v35  ;;  %v2571_v50 = vsub.f32 %v2151_v43, %v2553_v49  ;;  %v2570_v38 = vsub.f32 %v2073_v37, %v2550_v34 }
 0x5bd   : > { %v2581_v51 = vmul.f32 1.442695, %v2571_v50  ;;  %v2579_v52 = vmul.f32 1.442695, %v2570_v38  ;;  %v3249_v38 = vld [vmem:[#allocation7 + $0x20] sm:$0xff] }
 0x5be   : > { %v2559_v40 = vpop.xlane.xlu1 %2558  ;;  %v2556_v53 = vpop.xlane.xlu0 %2555 }
 0x5bf   : > { %4939 = vpow2.f32 %v2581_v51  ;;  %v2573_v36 = vsub.f32 %v2307_v16, %v2559_v40  ;;  %v2572_v54 = vsub.f32 %v2229_v15, %v2556_v53  ;;  %v3250_v51 = vld [vmem:[#allocation7 + $0x28] sm:$0xff] }
 0x5c0   : > { %4941 = vpow2.f32 %v2579_v52 }
 0x5c1   : > { %v2585_v44 = vmul.f32 1.442695, %v2573_v36  ;;  %v2583_v55 = vmul.f32 1.442695, %v2572_v54  ;;  %v4751_v54 = vpack.c.bf16 %v3250_v51, %v3249_v38 }
 0x5c2   : > { %v2565_v18 = vpop.xlane.xlu1 %2564  ;;  %v2562_v42 = vpop.xlane.xlu0 %2561 }
 0x5c3   : > { %4943 = vpow2.f32 %v2585_v44  ;;  %v2575_v19 = vsub.f32 %v2463_v24, %v2565_v18  ;;  %v2574_v20 = vsub.f32 %v2385_v23, %v2562_v42 }
 0x5c4   : > { %4945 = vpow2.f32 %v2583_v55 }
 0x5c5   : > { %v4938_v21 = vpop.eup %4937  ;;  %v2589_v56 = vmul.f32 1.442695, %v2575_v19  ;;  %v2587_v58 = vmul.f32 1.442695, %v2574_v20 }
 0x5c6   : > { %v2635_v60 = vpop.permute.xlu1 %2634  ;;  %v2568_v62 = vpop.xlane.xlu0 %2567  ;;  %v2593_v1 = vsel %vm1244_vm3, %v4938_v21, 0.0 }
 0x5c7   : > { %4947 = vpow2.f32 %v2589_v56  ;;  %v2576_v3 = vsub.f32 %v2541_v29, %v2568_v62  ;;  %2594 = vadd.xlane.f32.xlu1 %v2593_v1  ;;  %4600 = vmatpush3.msra.mxu1 %v2635_v60  ;;  %v3251_v56 = vld [vmem:[#allocation7 + $0x30] sm:$0xff]  ;;  %v1917_v62 = vld [vmem:[#allocation7] sm:$0xff]  ;;  %v1918_v1 = vld [vmem:[#allocation7 + $0x8] sm:$0xff] }
 0x5c8   : > { %4949 = vpow2.f32 %v2587_v58  ;;  %4609 = vmatprep.subr.mxu1 %v5236_v0  ;;  %v3252_v58 = vld [vmem:[#allocation7 + $0x38] sm:$0xff] }
 0x5c9   : > { %v4940_v5 = vpop.eup %4939  ;;  %v2591_v7 = vmul.f32 1.442695, %v2576_v3  ;;  %v4755_v60 = vpack.c.bf16 %v3252_v58, %v3251_v56  ;;  %v4759_v3 = vpack.c.bf16 %v1918_v1, %v1917_v62 }
 0x5ca   : > { %v4942_v9 = vpop.eup %4941  ;;  %v2712_v10 = vpop.permute.xlu0 %2711  ;;  %v2599_v11 = vsel %vm1244_vm3, %v4940_v5, 0.0 }
 0x5cb   : > { %4951 = vpow2.f32 %v2591_v7  ;;  %2600 = vadd.xlane.f32.xlu1 %v2599_v11  ;;  %v2596_v39 = vsel %vm1244_vm3, %v4942_v9, 0.0  ;;  %4605 = vmatpush3.msra.mxu0 %v2712_v10  ;;  %v2789_v17 = vpop.permute.xlu1 %2788  ;;  %v1920_v10 = vld [vmem:[#allocation7 + $0x18] sm:$0xff] }
 0x5cc   : > { %2597 = vadd.xlane.f32.xlu0 %v2596_v39  ;;  %4614 = vmatprep.subr.mxu0 %v5236_v0 }
 0x5cd   : > { %v4944_v37 = vpop.eup %4943 }
 0x5ce   : > { %v4946_v43 = vpop.eup %4945  ;;  %v2605_v12 = vsel %vm1244_vm3, %v4944_v37, 0.0  ;;  %v2943_v25 = vpop.permute.xlu0 %2942 }
 0x5cf   : > { %2606 = vadd.xlane.f32.xlu1 %v2605_v12  ;;  %v2602_v13 = vsel %vm1244_vm3, %v4946_v43, 0.0  ;;  %v2866_v22 = vpop.permute.xlu1 %2865 }
 0x5d0   : > { %2603 = vadd.xlane.f32.xlu0 %v2602_v13 }
 0x5d1   : > { %v4948_v14 = vpop.eup %4947 }
 0x5d2   : > { %v5845_v47 = vpop.eup %4949  ;;  %v2611_v15 = vsel %vm1244_vm3, %v4948_v14, 0.0 }
 0x5d3   : > { %2612 = vadd.xlane.f32.xlu1 %v2611_v15  ;;  %v2608_v16 = vsel %vm1244_vm3, %v5845_v47, 0.0  ;;  %v3020_v23 = vpop.permute.xlu1 %3019 }
 0x5d4   : > { %2609 = vadd.xlane.f32.xlu0 %v2608_v16 }
 0x5d5   : > { %v5850_v41 = vpop.eup %4951 }
 0x5d6   : > { %v2614_v45 = vsel %vm1244_vm3, %v5850_v41, 0.0 }
 0x5d8   : > { %2615 = vadd.xlane.f32.xlu0 %v2614_v45 }
 0x5e4   : > { %3173 = vrot.lane.b32.xlu1 %v5595_v48, %s5240_s10 }
 0x5ee   : > { %3096 = vrot.lane.b32.xlu0 %v5589_v46, %s5240_s10 }
 0x654   : > { %v2595_v24 = vpop.xlane.xlu1 %2594 }
 0x655   : > { %4953 = vrcp.f32 %v2595_v24  ;;  %v5001_v24 = vld [vmem:[%s5516_s29 + $0x8] sm:$0xff] }
 0x658   : > { %v2601_v26 = vpop.xlane.xlu1 %2600 }
 0x659   : > { %4955 = vrcp.f32 %v2601_v26  ;;  %v2598_v27 = vpop.xlane.xlu0 %2597  ;;  %v5002_v26 = vld [vmem:[%s5516_s29] sm:$0xff] }
 0x65a   : > { %4957 = vrcp.f32 %v2598_v27 }
 0x65c   : > { %v2607_v28 = vpop.xlane.xlu1 %2606 }
 0x65d   : > { %4959 = vrcp.f32 %v2607_v28  ;;  %v2604_v29 = vpop.xlane.xlu0 %2603 }
 0x65e   : > { %4961 = vrcp.f32 %v2604_v29 }
 0x65f   : > { %v4954_v30 = vpop.eup %4953 }
 0x660   : > { %v2625_v31 = vmul.f32 %v4954_v30, %v4938_v21  ;;  %v2613_v48 = vpop.xlane.xlu1 %2612  ;;  %v5003_v30 = vld [vmem:[%s5516_s29 + $0x10] sm:$0xff] }
 0x661   : > { %4963 = vrcp.f32 %v2613_v48  ;;  %v2610_v32 = vpop.xlane.xlu0 %2609 }
 0x662   : > { %4965 = vrcp.f32 %v2610_v32  ;;  %4602 = vmatmul.mubr.msk.f32.vlgmr.msra.gmra.mrb[36].mxu1 %vm1244_vm3, %v2625_v31  ;;  %v5004_v32 = vld [vmem:[%s5516_s29 + $0x18] sm:$0xff] }
 0x663   : > { %v4956_v46 = vpop.eup %4955  ;;  %4610 = vmatpush3.msra.mxu1 %v2789_v17  ;;  %4611 = vmatprep.mubr.msk.f32.mxu1 %vm5237_vm1, %v5236_v0 }
 0x664   : > { %v4958_v33 = vpop.eup %4957  ;;  %v2627_v35 = vmul.f32 %v4956_v46, %v4940_v5  ;;  %4619 = vmatprep.subr.mxu1 %v5236_v0  ;;  %v3174_v19 = vpop.permute.xlu1 %3173 }
 0x665   : > { %v2626_v49 = vmul.f32 %v4958_v33, %v4942_v9  ;;  %v2616_v34 = vpop.xlane.xlu0 %2615  ;;  %v1919_v9 = vld [vmem:[#allocation7 + $0x10] sm:$0xff] }
 0x666   : > { %4967 = vrcp.f32 %v2616_v34  ;;  %4612 = vmatmul.mubr.msk.f32.vlgmr.msra.gmra.mrb[38].mxu1 %vm1244_vm3, %v2627_v35  ;;  %v4763_v11 = vpack.c.bf16 %v1920_v10, %v1919_v9 }
 0x667   : > { %v4960_v50 = vpop.eup %4959  ;;  %4607 = vmatmul.mubr.msk.f32.vlgmr.msra.gmra.mrb[28].mxu0 %vm1244_vm3, %v2626_v49  ;;  %4620 = vmatpush3.msra.mxu1 %v2943_v25 }
 0x668   : > { %v4962_v52 = vpop.eup %4961  ;;  %v2629_v40 = vmul.f32 %v4960_v50, %v4944_v37  ;;  %4615 = vmatpush3.msra.mxu0 %v2866_v22  ;;  %4616 = vmatprep.mubr.msk.f32.mxu0 %vm5237_vm1, %v5236_v0  ;;  %v5005_v50 = vld [vmem:[%s5516_s29 + $0x20] sm:$0xff] }
 0x669   : > { %v2628_v53 = vmul.f32 %v4962_v52, %v4946_v43  ;;  %v3097_v36 = vpop.permute.xlu0 %3096  ;;  %4621 = vmatprep.mubr.msk.f32.mxu1 %vm5237_vm1, %v5236_v0  ;;  %4624 = vmatprep.subr.mxu0 %v5236_v0 }
 0x66a   : > { %4629 = vmatprep.subr.mxu1 %v5236_v0  ;;  %4622 = vmatmul.mubr.msk.f32.vlgmr.msra.gmra.mrb[40].mxu1 %vm1244_vm3, %v2629_v40 }
 0x66b   : > { %v4964_v44 = vpop.eup %4963  ;;  %4617 = vmatmul.mubr.msk.f32.vlgmr.msra.gmra.mrb[30].mxu0 %vm1244_vm3, %v2628_v53  ;;  %4630 = vmatpush3.msra.mxu1 %v3097_v36 }
 0x66c   : > { %v4966_v55 = vpop.eup %4965  ;;  %v2631_v18 = vmul.f32 %v4964_v44, %v4948_v14  ;;  %4625 = vmatpush3.msra.mxu0 %v3020_v23  ;;  %4626 = vmatprep.mubr.msk.f32.mxu0 %vm5237_vm1, %v5236_v0 }
 0x66d   : > { %v2630_v42 = vmul.f32 %v4966_v55, %v5845_v47  ;;  %4631 = vmatprep.mubr.msk.f32.mxu1 %vm5237_vm1, %v5236_v0  ;;  %4634 = vmatprep.subr.mxu0 %v5236_v0  ;;  %v5007_v55 = vld [vmem:[%s5516_s29 + $0x30] sm:$0xff] }
 0x66e   : > { %4632 = vmatmul.mubr.msk.f32.vlgmr.msra.gmra.mrb[42].mxu1 %vm1244_vm3, %v2631_v18  ;;  %4752 = vmatprep.subr.bf16.mxu1 %v4751_v54 }
 0x66f   : > { %4627 = vmatmul.mubr.msk.f32.vlgmr.msra.gmra.mrb[32].mxu0 %vm1244_vm3, %v2630_v42  ;;  %4754 = vmatpush3.bf16.msra.mxu1 %v4751_v54  ;;  %v5006_v54 = vld [vmem:[%s5516_s29 + $0x28] sm:$0xff] }
 0x670   : > { %v4968_v20 = vpop.eup %4967  ;;  %4635 = vmatpush3.msra.mxu0 %v3174_v19  ;;  %4636 = vmatprep.mubr.msk.f32.mxu0 %vm5237_vm1, %v5236_v0 }
 0x671   : > { %v2632_v21 = vmul.f32 %v4968_v20, %v5850_v41  ;;  %4756 = vmatprep.subr.bf16.mxu1 %v4755_v60  ;;  %v5008_v20 = vld [vmem:[%s5516_s29 + $0x38] sm:$0xff] }
 0x673   : > { %4637 = vmatmul.mubr.msk.f32.vlgmr.msra.gmra.mrb[34].mxu0 %vm1244_vm3, %v2632_v21  ;;  %4758 = vmatpush3.bf16.msra.mxu1 %v4755_v60 }
 0x674   : > { %4760 = vmatprep.subr.bf16.mxu1 %v4759_v3 }
 0x735   : > { %v2706_v5 = vpop.f32.mrb[36].mxu1 }
 0x736   : > { %v4603_v7 = vpop.f32.mrb[37].mxu1  ;;  %4647 = vmatprep.mubr.msk.f32.mxu1 %vm630_vm2, %v2706_v5 }
 0x739   : > { %v2860_v0 = vpop.f32.mrb[38].mxu1 }
 0x73a   : > { %v2783_v39 = vpop.f32.mrb[28].mxu0  ;;  %v4613_v37 = vpop.f32.mrb[39].mxu1 }
 0x73b   : > { %v4608_v43 = vpop.f32.mrb[29].mxu0  ;;  %4648 = vmatmul.mubr.msk.f32.vlgmr.msra.gmra.mrb[44].mxu1 %vm630_vm2, %v2783_v39 }
 0x73c   : > { %4650 = vmatprep.mubr.msk.f32.mxu1 %vm630_vm2, %v2860_v0  ;;  %4762 = vmatpush3.bf16.msra.mxu1 %v4759_v3 }
 0x73d   : > { %v3014_v12 = vpop.f32.mrb[40].mxu1  ;;  %4764 = vmatprep.subr.bf16.mxu1 %v4763_v11 }
 0x73e   : > { %v2937_v13 = vpop.f32.mrb[30].mxu0  ;;  %v4623_v14 = vpop.f32.mrb[41].mxu1 }
 0x73f   : > { %v4618_v47 = vpop.f32.mrb[31].mxu0  ;;  %4651 = vmatmul.mubr.msk.f32.gmra.mrb[46].mxu1 %vm630_vm2, %v2937_v13 }
 0x740   : > { %4653 = vmatprep.mubr.msk.f32.mxu1 %vm630_vm2, %v3014_v12  ;;  %4766 = vmatpush3.bf16.msra.mxu1 %v4763_v11 }
 0x741   : > { %v3168_v15 = vpop.f32.mrb[42].mxu1 }
 0x742   : > { %v3091_v16 = vpop.f32.mrb[32].mxu0  ;;  %v4633_v41 = vpop.f32.mrb[43].mxu1 }
 0x743   : > { %v4628_v45 = vpop.f32.mrb[33].mxu0  ;;  %4654 = vmatmul.mubr.msk.f32.gmra.mrb[48].mxu1 %vm630_vm2, %v3091_v16 }
 0x744   : > { %4656 = vmatprep.mubr.msk.f32.mxu1 %vm630_vm2, %v3168_v15 }
 0x746   : > { %v3245_v17 = vpop.f32.mrb[34].mxu0 }
 0x747   : > { %v4638_v22 = vpop.f32.mrb[35].mxu0  ;;  %4657 = vmatmul.mubr.msk.f32.gmra.mrb[50].mxu1 %vm630_vm2, %v3245_v17 }
 0x748   : > { %4667 = vmatprep.mubr.msk.f32.mxu1 %vm630_vm2, %v5802_v57 }
 0x74b   : > { %4668 = vmatmul.mubr.msk.f32.vlgmr.msra.gmra.mrb[44].mxu1 %vm630_vm2, %v5804_v59 }
 0x74c   : > { %4670 = vmatprep.mubr.msk.f32.mxu1 %vm630_vm2, %v5806_v61 }
 0x74f   : > { %4671 = vmatmul.mubr.msk.f32.gmra.mrb[46].mxu1 %vm630_vm2, %v5808_v63 }
 0x750   : > { %4673 = vmatprep.mubr.msk.f32.mxu1 %vm630_vm2, %v5810_v2 }
 0x753   : > { %4674 = vmatmul.mubr.msk.f32.gmra.mrb[48].mxu1 %vm630_vm2, %v5812_v4 }
 0x754   : > { %4676 = vmatprep.mubr.msk.f32.mxu1 %vm630_vm2, %v5814_v6 }
 0x757   : > { %4677 = vmatmul.mubr.msk.f32.gmra.mrb[50].mxu1 %vm630_vm2, %v5816_v8 }
 0x81e   : > { %v4669_v57 = vpop.f32.mrb[44].mxu1 }
 0x81f   : > { %v3512_v59 = vmax.f32 %v4669_v57, 0.0  ;;  %v3472_v23 = vpop.f32.mrb[45].mxu1 }
 0x820   : > { %v3511_v61 = vmax.f32 %v3472_v23, 0.0 }
 0x821   : > { %v3520_v63 = vadd.f32 %v5001_v24, %v3512_v59 }
 0x822   : > { %v4672_v25 = vpop.f32.mrb[46].mxu1  ;;  %v3519_v2 = vadd.f32 %v5002_v26, %v3511_v61 }
 0x823   : > { %v3514_v27 = vmax.f32 %v4672_v25, 0.0  ;;  %v3482_v28 = vpop.f32.mrb[47].mxu1  ;;  %v3532_v4 = vsel %vm489_vm0, %v3520_v63, 0.0 }
 0x824   : > { %v3513_v6 = vmax.f32 %v3482_v28, 0.0  ;;  %3533 = vadd.xlane.f32.xlu1 %v3532_v4  ;;  %v3529_v8 = vsel %vm489_vm0, %v3519_v2, 0.0 }
 0x825   : > { %3530 = vadd.xlane.f32.xlu0 %v3529_v8  ;;  %v3522_v46 = vadd.f32 %v5004_v32, %v3514_v27 }
 0x826   : > { %v4675_v29 = vpop.f32.mrb[48].mxu1  ;;  %v3521_v31 = vadd.f32 %v5003_v30, %v3513_v6 }
 0x827   : > { %v3492_v48 = vpop.f32.mrb[49].mxu1  ;;  %v3516_v33 = vmax.f32 %v4675_v29, 0.0  ;;  %v3538_v52 = vsel %vm489_vm0, %v3522_v46, 0.0 }
 0x828   : > { %v3515_v35 = vmax.f32 %v3492_v48, 0.0  ;;  %v3535_v49 = vsel %vm489_vm0, %v3521_v31, 0.0  ;;  %v3663_v48 = vld [vmem:[#allocation8 + $0x8] sm:$0xff] }
 0x829   : > { %3536 = vadd.xlane.f32.xlu0 %v3535_v49  ;;  %v3524_v44 = vadd.f32 %v5006_v54, %v3516_v33  ;;  %v3665_v33 = vld [vmem:[#allocation8 + $0x18] sm:$0xff]  ;;  %v3666_v49 = vld [vmem:[#allocation8 + $0x20] sm:$0xff] }
 0x82a   : > { %v4678_v34 = vpop.f32.mrb[50].mxu1  ;;  %v3523_v38 = vadd.f32 %v5005_v50, %v3515_v35 }
 0x82b   : > { %v3502_v51 = vpop.f32.mrb[51].mxu1  ;;  %v3518_v40 = vmax.f32 %v4678_v34, 0.0  ;;  %v3544_v42 = vsel %vm489_vm0, %v3524_v44, 0.0  ;;  %v3667_v34 = vld [vmem:[#allocation8 + $0x28] sm:$0xff] }
 0x82c   : > { %v3517_v53 = vmax.f32 %v3502_v51, 0.0  ;;  %v3541_v36 = vsel %vm489_vm0, %v3523_v38, 0.0  ;;  %v4775_v50 = vpack.c.bf16 %v3667_v34, %v3666_v49  ;;  %v3669_v51 = vld [vmem:[#allocation8 + $0x38] sm:$0xff] }
 0x82d   : > { %3539 = vadd.xlane.f32.xlu0 %v3538_v52  ;;  %3542 = vadd.xlane.f32.xlu1 %v3541_v36  ;;  %v3526_v21 = vadd.f32 %v5008_v20, %v3518_v40  ;;  %v3814_v40 = vld [vmem:[#allocation10] sm:$0xff] }
 0x82e   : > { %v3525_v18 = vadd.f32 %v5007_v55, %v3517_v53  ;;  %v3815_v53 = vld [vmem:[#allocation10 + $0x8] sm:$0xff] }
 0x82f   : > { %v3550_v56 = vsel %vm489_vm0, %v3526_v21, 0.0  ;;  %v4783_v36 = vpack.c.bf16 %v3815_v53, %v3814_v40 }
 0x830   : > { %v3547_v19 = vsel %vm489_vm0, %v3525_v18, 0.0 }
 0x831   : > { %3545 = vadd.xlane.f32.xlu0 %v3544_v42  ;;  %3548 = vadd.xlane.f32.xlu1 %v3547_v19 }
 0x835   : > { %3551 = vadd.xlane.f32.xlu0 %v3550_v56 }
 0x8b1   : > { %v3534_v58 = vpop.xlane.xlu1 %3533 }
 0x8b2   : > { %v3555_v60 = vmul.f32 0.015625, %v3534_v58  ;;  %v3531_v62 = vpop.xlane.xlu0 %3530 }
 0x8b3   : > { %v3554_v1 = vmul.f32 0.015625, %v3531_v62 }
 0x8b4   : > { %v5924_v3 = vsub.f32 %v3520_v63, %v3555_v60 }
 0x8b5   : > { %v5926_v5 = vsub.f32 %v3519_v2, %v3554_v1 }
 0x8b6   : > { %v3537_v7 = vpop.xlane.xlu0 %3536  ;;  %v3571_v9 = vmul.f32 %v5924_v3, %v5924_v3 }
 0x8b7   : > { %v3556_v10 = vmul.f32 0.015625, %v3537_v7  ;;  %v3570_v0 = vmul.f32 %v5926_v5, %v5926_v5 }
 0x8b8   : > { %v3581_v11 = vsel %vm489_vm0, %v3571_v9, 0.0 }
 0x8b9   : > { %v5933_v39 = vsub.f32 %v3521_v31, %v3556_v10  ;;  %3582 = vadd.xlane.f32.xlu0 %v3581_v11  ;;  %v3578_v37 = vsel %vm489_vm0, %v3570_v0, 0.0  ;;  %v3662_v31 = vld [vmem:[#allocation8] sm:$0xff] }
 0x8ba   : > { %v3540_v43 = vpop.xlane.xlu0 %3539  ;;  %v3543_v12 = vpop.xlane.xlu1 %3542  ;;  %3579 = vadd.xlane.f32.xlu1 %v3578_v37  ;;  %v4767_v32 = vpack.c.bf16 %v3663_v48, %v3662_v31 }
 0x8bb   : > { %v3557_v13 = vmul.f32 0.015625, %v3540_v43  ;;  %v3558_v14 = vmul.f32 0.015625, %v3543_v12  ;;  %v3572_v47 = vmul.f32 %v5933_v39, %v5933_v39  ;;  %v4330_v12 = vld [vmem:[%s6168_s3] ss:$0 sm:$0xff] }
 0x8bc   : > { %4768 = vmatprep.subr.bf16.mxu0 %v4767_v32 }
 0x8bd   : > { %v5938_v15 = vsub.f32 %v3522_v46, %v3557_v13  ;;  %v5940_v16 = vsub.f32 %v3523_v38, %v3558_v14  ;;  %v3584_v41 = vsel %vm489_vm0, %v3572_v47, 0.0  ;;  %4770 = vmatpush3.bf16.msra.mxu0 %v4767_v32  ;;  %v3664_v46 = vld [vmem:[#allocation8 + $0x10] sm:$0xff] }
 0x8be   : > { %v3546_v45 = vpop.xlane.xlu0 %3545  ;;  %3585 = vadd.xlane.f32.xlu1 %v3584_v41  ;;  %v3549_v17 = vpop.xlane.xlu1 %3548  ;;  %v4771_v35 = vpack.c.bf16 %v3665_v33, %v3664_v46  ;;  %v3668_v38 = vld [vmem:[#allocation8 + $0x30] sm:$0xff] }
 0x8bf   : > { %v3559_v22 = vmul.f32 0.015625, %v3546_v45  ;;  %v3560_v57 = vmul.f32 0.015625, %v3549_v17  ;;  %v3573_v59 = vmul.f32 %v5938_v15, %v5938_v15  ;;  %v3574_v23 = vmul.f32 %v5940_v16, %v5940_v16 }
 0x8c0   : > { %4772 = vmatprep.subr.bf16.mxu0 %v4771_v35  ;;  %v4779_v52 = vpack.c.bf16 %v3669_v51, %v3668_v38 }
 0x8c1   : > { %v5947_v61 = vsub.f32 %v3524_v44, %v3559_v22  ;;  %v5949_v24 = vsub.f32 %v3525_v18, %v3560_v57  ;;  %v3587_v63 = vsel %vm489_vm0, %v3573_v59, 0.0  ;;  %v3590_v25 = vsel %vm489_vm0, %v3574_v23, 0.0  ;;  %4774 = vmatpush3.bf16.msra.mxu0 %v4771_v35  ;;  %v4331_v57 = vld [vmem:[%s6169_s4] ss:$0 sm:$0xff] }
 0x8c2   : > { %3588 = vadd.xlane.f32.xlu0 %v3587_v63  ;;  %v3552_v26 = vpop.xlane.xlu0 %3551  ;;  %3591 = vadd.xlane.f32.xlu1 %v3590_v25  ;;  %v3816_v63 = vld [vmem:[#allocation10 + $0x10] sm:$0xff]  ;;  %v3817_v25 = vld [vmem:[#allocation10 + $0x18] sm:$0xff] }
 0x8c3   : > { %v3561_v2 = vmul.f32 0.015625, %v3552_v26  ;;  %v3575_v27 = vmul.f32 %v5947_v61, %v5947_v61  ;;  %v3576_v28 = vmul.f32 %v5949_v24, %v5949_v24  ;;  %4776 = vmatprep.subr.bf16.mxu0 %v4775_v50 }
 0x8c5   : > { %v5957_v4 = vsub.f32 %v3526_v21, %v3561_v2  ;;  %v3593_v6 = vsel %vm489_vm0, %v3575_v27, 0.0  ;;  %v3596_v8 = vsel %vm489_vm0, %v3576_v28, 0.0  ;;  %4778 = vmatpush3.bf16.msra.mxu0 %v4775_v50 }
 0x8c6   : > { %3594 = vadd.xlane.f32.xlu0 %v3593_v6  ;;  %3597 = vadd.xlane.f32.xlu1 %v3596_v8  ;;  %v3818_v8 = vld [vmem:[#allocation10 + $0x20] sm:$0xff] }
 0x8c7   : > { %v3577_v29 = vmul.f32 %v5957_v4, %v5957_v4  ;;  %4780 = vmatprep.subr.bf16.mxu0 %v4779_v52 }
 0x8c9   : > { %v3599_v30 = vsel %vm489_vm0, %v3577_v29, 0.0  ;;  %4782 = vmatpush3.bf16.msra.mxu0 %v4779_v52  ;;  %v3819_v29 = vld [vmem:[#allocation10 + $0x28] sm:$0xff] }
 0x8ca   : > { %3600 = vadd.xlane.f32.xlu0 %v3599_v30  ;;  %4784 = vmatprep.subr.bf16.mxu0 %v4783_v36  ;;  %v4791_v46 = vpack.c.bf16 %v3819_v29, %v3818_v8 }
 0x946   : > { %v3583_v54 = vpop.xlane.xlu0 %3582 }
 0x947   : > { %v3603_v44 = vmul.f32 0.015625, %v3583_v54  ;;  %v3580_v55 = vpop.xlane.xlu1 %3579 }
 0x948   : > { %v3602_v18 = vmul.f32 0.015625, %v3580_v55  ;;  %v3821_v55 = vld [vmem:[#allocation10 + $0x38] sm:$0xff] }
 0x949   : > { %v3611_v42 = vadd.f32 1e-05, %v3603_v44  ;;  %v3820_v44 = vld [vmem:[#allocation10 + $0x30] sm:$0xff] }
 0x94a   : > { %v3610_v19 = vadd.f32 1e-05, %v3602_v18  ;;  %v4795_v18 = vpack.c.bf16 %v3821_v55, %v3820_v44 }
 0x94b   : > { %4969 = vrsqrt.f32 %v3611_v42  ;;  %v3586_v20 = vpop.xlane.xlu1 %3585 }
 0x94c   : > { %4971 = vrsqrt.f32 %v3610_v19  ;;  %v3604_v21 = vmul.f32 0.015625, %v3586_v20 }
 0x94e   : > { %v3612_v56 = vadd.f32 1e-05, %v3604_v21 }
 0x94f   : > { %v3589_v58 = vpop.xlane.xlu0 %3588  ;;  %v3592_v60 = vpop.xlane.xlu1 %3591 }
 0x950   : > { %4973 = vrsqrt.f32 %v3612_v56  ;;  %v3605_v62 = vmul.f32 0.015625, %v3589_v58  ;;  %v3606_v1 = vmul.f32 0.015625, %v3592_v60 }
 0x952   : > { %v3613_v7 = vadd.f32 1e-05, %v3605_v62  ;;  %v3614_v9 = vadd.f32 1e-05, %v3606_v1 }
 0x953   : > { %v3595_v10 = vpop.xlane.xlu0 %3594  ;;  %v3598_v0 = vpop.xlane.xlu1 %3597 }
 0x954   : > { %4975 = vrsqrt.f32 %v3613_v7  ;;  %v3607_v11 = vmul.f32 0.015625, %v3595_v10  ;;  %v3608_v37 = vmul.f32 0.015625, %v3598_v0 }
 0x955   : > { %v4970_v43 = vpop.eup %4969  ;;  %4977 = vrsqrt.f32 %v3614_v9 }
 0x956   : > { %v4972_v13 = vpop.eup %4971  ;;  %v3627_v14 = vmul.f32 %v4970_v43, %v5924_v3  ;;  %v3615_v47 = vadd.f32 1e-05, %v3607_v11  ;;  %v3616_v41 = vadd.f32 1e-05, %v3608_v37 }
 0x957   : > { %v3601_v45 = vpop.xlane.xlu0 %3600  ;;  %v3626_v17 = vmul.f32 %v4972_v13, %v5926_v5  ;;  %v4787_v5 = vpack.c.bf16 %v3817_v25, %v3816_v63 }
 0x958   : > { %4979 = vrsqrt.f32 %v3615_v47  ;;  %v3609_v22 = vmul.f32 0.015625, %v3601_v45  ;;  %v3641_v59 = vmul.f32 %v4330_v12, %v3627_v14 }
 0x959   : > { %4981 = vrsqrt.f32 %v3616_v41  ;;  %v3640_v23 = vmul.f32 %v4330_v12, %v3626_v17 }
 0x95a   : > { %v4974_v26 = vpop.eup %4973  ;;  %v3617_v2 = vadd.f32 1e-05, %v3609_v22  ;;  %v5975_v28 = vadd.f32 %v4331_v57, %v3641_v59 }
 0x95b   : > { %v5972_v27 = vadd.f32 %v4331_v57, %v3640_v23  ;;  %v3628_v3 = vmul.f32 %v4974_v26, %v5933_v39 }
 0x95c   : > { %4983 = vrsqrt.f32 %v3617_v2 }
 0x95d   : > { %4695 = vmatprep.mubr.msk.f32.mxu0 %vm489_vm0, %v5972_v27  ;;  %v3642_v6 = vmul.f32 %v4330_v12, %v3628_v3 }
 0x95e   : > { %v4976_v30 = vpop.eup %4975  ;;  %4696 = vmatmul.mubr.msk.f32.vlgmr.msra.gmra.mrb[36].mxu0 %vm489_vm0, %v5975_v28 }
 0x95f   : > { %v4978_v31 = vpop.eup %4977  ;;  %v5981_v48 = vadd.f32 %v4331_v57, %v3642_v6  ;;  %v3629_v32 = vmul.f32 %v4976_v30, %v5938_v15  ;;  %4786 = vmatpush3.bf16.msra.mxu0 %v4783_v36 }
 0x960   : > { %v3630_v39 = vmul.f32 %v4978_v31, %v5940_v16  ;;  %4788 = vmatprep.subr.bf16.mxu0 %v4787_v5 }
 0x961   : > { %4698 = vmatprep.mubr.msk.f32.mxu0 %vm489_vm0, %v5981_v48  ;;  %v3643_v33 = vmul.f32 %v4330_v12, %v3629_v32 }
 0x962   : > { %v4980_v35 = vpop.eup %4979  ;;  %v3644_v49 = vmul.f32 %v4330_v12, %v3630_v39 }
 0x963   : > { %v4982_v34 = vpop.eup %4981  ;;  %v5987_v50 = vadd.f32 %v4331_v57, %v3643_v33  ;;  %v3631_v38 = vmul.f32 %v4980_v35, %v5947_v61  ;;  %4790 = vmatpush3.bf16.msra.mxu0 %v4787_v5 }
 0x964   : > { %v5990_v51 = vadd.f32 %v4331_v57, %v3644_v49  ;;  %v3632_v15 = vmul.f32 %v4982_v34, %v5949_v24  ;;  %4792 = vmatprep.subr.bf16.mxu0 %v4791_v46 }
 0x965   : > { %4699 = vmatmul.mubr.msk.f32.gmra.mrb[38].mxu0 %vm489_vm0, %v5987_v50  ;;  %v3645_v16 = vmul.f32 %v4330_v12, %v3631_v38 }
 0x966   : > { %v4984_v52 = vpop.eup %4983  ;;  %4701 = vmatprep.mubr.msk.f32.mxu0 %vm489_vm0, %v5990_v51  ;;  %v3646_v40 = vmul.f32 %v4330_v12, %v3632_v15 }
 0x967   : > { %v5997_v53 = vadd.f32 %v4331_v57, %v3645_v16  ;;  %v3633_v36 = vmul.f32 %v4984_v52, %v5957_v4  ;;  %4794 = vmatpush3.bf16.msra.mxu0 %v4791_v46  ;;  %v4332_v4 = vld [vmem:[%s6171_s6] ss:$0 sm:$0xff] }
 0x968   : > { %v6000_v61 = vadd.f32 %v4331_v57, %v3646_v40  ;;  %4796 = vmatprep.subr.bf16.mxu0 %v4795_v18 }
 0x969   : > { %4702 = vmatmul.mubr.msk.f32.gmra.mrb[40].mxu0 %vm489_vm0, %v5997_v53  ;;  %v3647_v24 = vmul.f32 %v4330_v12, %v3633_v36 }
 0x96a   : > { %4704 = vmatprep.mubr.msk.f32.mxu0 %vm489_vm0, %v6000_v61 }
 0x96b   : > { %v6006_v54 = vadd.f32 %v4331_v57, %v3647_v24  ;;  %4798 = vmatpush3.bf16.msra.mxu0 %v4795_v18  ;;  %v4341_v57 = vld [vmem:[%s6203_s13] ss:$0 sm:$0xff]  ;;  %s5241_s13 = smov [#allocation11]  }
 0x96c   : > { %s5155_s24 = sshll.u32 %s5241_s13, 4  ;;  %s5156_s24 = int_to_ptr.vmem [resolvable:$false] %s5155_s24 }
 0x96d   : > { %4705 = vmatmul.mubr.msk.f32.gmra.mrb[42].mxu0 %vm489_vm0, %v6006_v54  ;;  %s5157_s29 = scalar_lea.vmem %s5156_s24, 2048  ;;  %p5158_p3 = scmp.lt.s32.totalorder %s6117_s16, %s5156_s24 }
 0x96e   : > { %p5159_p7 = scmp.lt.s32.totalorder %s5157_s29, %s5151_s27 }
 0x970   : > { %p5160_p9 = por %p5159_p7, %p5158_p3 }
 0x972   : > { %p5161_p13 = pnand %p5160_p9, %p5154_p12 }
 0xa31   : > { %v4697_v42 = vpop.f32.mrb[36].mxu0 }
 0xa32   : > { %v3773_v19 = vadd.f32 %v4697_v42, %v4332_v4  ;;  %v3767_v20 = vpop.f32.mrb[37].mxu0 }
 0xa33   : > { %v3768_v21 = vadd.f32 %v4332_v4, %v3767_v20 }
 0xa34   : > { %v3807_v58 = vmax.f32 %v3773_v19, 0.0 }
 0xa35   : > { %v3806_v56 = vmax.f32 %v3768_v21, 0.0 }
 0xa37   : > { %4723 = vmatprep.mubr.msk.f32.mxu0 %vm489_vm0, %v3806_v56 }
 0xa38   : > { %v4700_v60 = vpop.f32.mrb[38].mxu0  ;;  %4724 = vmatmul.mubr.msk.f32.vlgmr.msra.gmra.mrb[44].mxu0 %vm489_vm0, %v3807_v58 }
 0xa39   : > { %v3783_v62 = vadd.f32 %v4700_v60, %v4332_v4  ;;  %v3777_v1 = vpop.f32.mrb[39].mxu0 }
 0xa3a   : > { %v3778_v7 = vadd.f32 %v4332_v4, %v3777_v1 }
 0xa3b   : > { %v3809_v0 = vmax.f32 %v3783_v62, 0.0 }
 0xa3c   : > { %v3808_v9 = vmax.f32 %v3778_v7, 0.0  ;;  %v4703_v10 = vpop.f32.mrb[40].mxu0 }
 0xa3d   : > { %v3793_v11 = vadd.f32 %v4703_v10, %v4332_v4  ;;  %v3787_v37 = vpop.f32.mrb[41].mxu0 }
 0xa3e   : > { %v3788_v43 = vadd.f32 %v4332_v4, %v3787_v37  ;;  %4726 = vmatprep.mubr.msk.f32.mxu0 %vm489_vm0, %v3808_v9 }
 0xa3f   : > { %4727 = vmatmul.mubr.msk.f32.gmra.mrb[46].mxu0 %vm489_vm0, %v3809_v0  ;;  %v3811_v14 = vmax.f32 %v3793_v11, 0.0 }
 0xa40   : > { %v3810_v12 = vmax.f32 %v3788_v43, 0.0  ;;  %v4706_v13 = vpop.f32.mrb[42].mxu0 }
 0xa41   : > { %v3803_v47 = vadd.f32 %v4706_v13, %v4332_v4  ;;  %v3797_v41 = vpop.f32.mrb[43].mxu0 }
 0xa42   : > { %v3798_v45 = vadd.f32 %v4332_v4, %v3797_v41  ;;  %4729 = vmatprep.mubr.msk.f32.mxu0 %vm489_vm0, %v3810_v12 }
 0xa43   : > { %4730 = vmatmul.mubr.msk.f32.gmra.mrb[48].mxu0 %vm489_vm0, %v3811_v14  ;;  %v3813_v22 = vmax.f32 %v3803_v47, 0.0 }
 0xa44   : > { %v3812_v17 = vmax.f32 %v3798_v45, 0.0 }
 0xa46   : > { %4732 = vmatprep.mubr.msk.f32.mxu0 %vm489_vm0, %v3812_v17 }
 0xa47   : > { %4733 = vmatmul.mubr.msk.f32.gmra.mrb[50].mxu0 %vm489_vm0, %v3813_v22 }
 0xb0b   : > { %v4725_v59 = vpop.f32.mrb[44].mxu0 }
 0xb0c   : > { %v3925_v23 = vadd.f32 %v4725_v59, %v4341_v57  ;;  %v3919_v63 = vpop.f32.mrb[45].mxu0 }
 0xb0d   : > { %v3920_v25 = vadd.f32 %v4341_v57, %v3919_v63 }
 0xb0e   : > { %v3959_v26 = vmax.f32 %v3925_v23, 0.0 }
 0xb0f   : > { %v3958_v2 = vmax.f32 %v3920_v25, 0.0 }
 0xb10   : > { %v3967_v3 = vadd.f32 %v3959_v26, %v5975_v28 }
 0xb11   : > { %v3966_v5 = vadd.f32 %v3958_v2, %v5972_v27 }
 0xb12   : > { %v4728_v6 = vpop.f32.mrb[46].mxu0  ;;  %v3979_v8 = vsel %vm489_vm0, %v3967_v3, 0.0 }
 0xb13   : > { %v3935_v29 = vadd.f32 %v4728_v6, %v4341_v57  ;;  %3980 = vadd.xlane.f32.xlu0 %v3979_v8  ;;  %v3929_v30 = vpop.f32.mrb[47].mxu0  ;;  %v3976_v31 = vsel %vm489_vm0, %v3966_v5, 0.0 }
 0xb14   : > { %v3930_v32 = vadd.f32 %v4341_v57, %v3929_v30  ;;  %3977 = vadd.xlane.f32.xlu1 %v3976_v31 }
 0xb15   : > { %v3961_v39 = vmax.f32 %v3935_v29, 0.0 }
 0xb16   : > { %v3960_v46 = vmax.f32 %v3930_v32, 0.0  ;;  %v4731_v33 = vpop.f32.mrb[48].mxu0 }
 0xb17   : > { %v3945_v35 = vadd.f32 %v4731_v33, %v4341_v57  ;;  %v3939_v49 = vpop.f32.mrb[49].mxu0  ;;  %v3969_v34 = vadd.f32 %v3961_v39, %v5987_v50 }
 0xb18   : > { %v3940_v28 = vadd.f32 %v4341_v57, %v3939_v49  ;;  %v3968_v27 = vadd.f32 %v3960_v46, %v5981_v48 }
 0xb19   : > { %v3963_v38 = vmax.f32 %v3945_v35, 0.0  ;;  %v3985_v15 = vsel %vm489_vm0, %v3969_v34, 0.0 }
 0xb1a   : > { %v3962_v16 = vmax.f32 %v3940_v28, 0.0  ;;  %3986 = vadd.xlane.f32.xlu0 %v3985_v15  ;;  %v4734_v52 = vpop.f32.mrb[50].mxu0  ;;  %v3982_v40 = vsel %vm489_vm0, %v3968_v27, 0.0 }
 0xb1b   : > { %v3955_v36 = vadd.f32 %v4734_v52, %v4341_v57  ;;  %v3949_v24 = vpop.f32.mrb[51].mxu0  ;;  %3983 = vadd.xlane.f32.xlu1 %v3982_v40  ;;  %v3971_v44 = vadd.f32 %v3963_v38, %v5997_v53 }
 0xb1c   : > { %v3950_v55 = vadd.f32 %v4341_v57, %v3949_v24  ;;  %v3970_v18 = vadd.f32 %v3962_v16, %v5990_v51 }
 0xb1d   : > { %v3965_v50 = vmax.f32 %v3955_v36, 0.0  ;;  %v3991_v4 = vsel %vm489_vm0, %v3971_v44, 0.0 }
 0xb1e   : > { %v3964_v48 = vmax.f32 %v3950_v55, 0.0  ;;  %3992 = vadd.xlane.f32.xlu0 %v3991_v4  ;;  %v3988_v42 = vsel %vm489_vm0, %v3970_v18, 0.0 }
 0xb1f   : > { %3989 = vadd.xlane.f32.xlu1 %v3988_v42  ;;  %v3973_v19 = vadd.f32 %v3965_v50, %v6006_v54 }
 0xb20   : > { %v3972_v20 = vadd.f32 %v3964_v48, %v6000_v61  ;;  %v4350_v48 = vld [vmem:[%s6204_s23] ss:$0 sm:$0xff] }
 0xb21   : > { %v3997_v21 = vsel %vm489_vm0, %v3973_v19, 0.0 }
 0xb22   : > { %3998 = vadd.xlane.f32.xlu0 %v3997_v21  ;;  %v3994_v53 = vsel %vm489_vm0, %v3972_v20, 0.0 }
 0xb23   : > { %3995 = vadd.xlane.f32.xlu1 %v3994_v53 }
 0xba0   : > { %v3981_v56 = vpop.xlane.xlu0 %3980 }
 0xba1   : > { %v4001_v51 = vmul.f32 0.015625, %v3981_v56  ;;  %v3978_v58 = vpop.xlane.xlu1 %3977 }
 0xba2   : > { %v4000_v60 = vmul.f32 0.015625, %v3978_v58 }
 0xba3   : > { %v6040_v62 = vsub.f32 %v3967_v3, %v4001_v51  ;;  %v4351_v51 = vld [vmem:[%s6205_s17] ss:$0 sm:$0xff] }
 0xba4   : > { %v6042_v1 = vsub.f32 %v3966_v5, %v4000_v60 }
 0xba5   : > { %v4017_v7 = vmul.f32 %v6040_v62, %v6040_v62 }
 0xba6   : > { %v4016_v61 = vmul.f32 %v6042_v1, %v6042_v1 }
 0xba7   : > { %v3987_v54 = vpop.xlane.xlu0 %3986  ;;  %v4027_v9 = vsel %vm489_vm0, %v4017_v7, 0.0 }
 0xba8   : > { %v4003_v10 = vmul.f32 0.015625, %v3987_v54  ;;  %4028 = vadd.xlane.f32.xlu0 %v4027_v9  ;;  %v3984_v0 = vpop.xlane.xlu1 %3983  ;;  %v4024_v11 = vsel %vm489_vm0, %v4016_v61, 0.0 }
 0xba9   : > { %v4002_v37 = vmul.f32 0.015625, %v3984_v0  ;;  %4025 = vadd.xlane.f32.xlu1 %v4024_v11 }
 0xbaa   : > { %v6050_v43 = vsub.f32 %v3969_v34, %v4003_v10 }
 0xbab   : > { %v6052_v12 = vsub.f32 %v3968_v27, %v4002_v37  ;;  %v3993_v13 = vpop.xlane.xlu0 %3992 }
 0xbac   : > { %v4005_v14 = vmul.f32 0.015625, %v3993_v13  ;;  %v3990_v47 = vpop.xlane.xlu1 %3989  ;;  %v4019_v41 = vmul.f32 %v6050_v43, %v6050_v43 }
 0xbad   : > { %v4004_v45 = vmul.f32 0.015625, %v3990_v47  ;;  %v4018_v17 = vmul.f32 %v6052_v12, %v6052_v12 }
 0xbae   : > { %v6058_v22 = vsub.f32 %v3971_v44, %v4005_v14  ;;  %v4033_v57 = vsel %vm489_vm0, %v4019_v41, 0.0 }
 0xbaf   : > { %v6061_v59 = vsub.f32 %v3970_v18, %v4004_v45  ;;  %4034 = vadd.xlane.f32.xlu0 %v4033_v57  ;;  %v3999_v23 = vpop.xlane.xlu0 %3998  ;;  %v4030_v63 = vsel %vm489_vm0, %v4018_v17, 0.0 }
 0xbb0   : > { %v4007_v25 = vmul.f32 0.015625, %v3999_v23  ;;  %4031 = vadd.xlane.f32.xlu1 %v4030_v63  ;;  %v3996_v26 = vpop.xlane.xlu1 %3995  ;;  %v4021_v2 = vmul.f32 %v6058_v22, %v6058_v22 }
 0xbb1   : > { %v4006_v3 = vmul.f32 0.015625, %v3996_v26  ;;  %v4020_v5 = vmul.f32 %v6061_v59, %v6061_v59 }
 0xbb2   : > { %v6068_v6 = vsub.f32 %v3973_v19, %v4007_v25  ;;  %v4039_v8 = vsel %vm489_vm0, %v4021_v2, 0.0 }
 0xbb3   : > { %v6071_v29 = vsub.f32 %v3972_v20, %v4006_v3  ;;  %4040 = vadd.xlane.f32.xlu0 %v4039_v8  ;;  %v4036_v30 = vsel %vm489_vm0, %v4020_v5, 0.0 }
 0xbb4   : > { %4037 = vadd.xlane.f32.xlu1 %v4036_v30  ;;  %v4023_v31 = vmul.f32 %v6068_v6, %v6068_v6 }
 0xbb5   : > { %v4022_v32 = vmul.f32 %v6071_v29, %v6071_v29 }
 0xbb6   : > { %v4045_v39 = vsel %vm489_vm0, %v4023_v31, 0.0 }
 0xbb7   : > { %4046 = vadd.xlane.f32.xlu0 %v4045_v39  ;;  %v4042_v46 = vsel %vm489_vm0, %v4022_v32, 0.0 }
 0xbb8   : > { %4043 = vadd.xlane.f32.xlu1 %v4042_v46 }
 0xc35   : > { %v4029_v33 = vpop.xlane.xlu0 %4028 }
 0xc36   : > { %v4049_v35 = vmul.f32 0.015625, %v4029_v33  ;;  %v4026_v49 = vpop.xlane.xlu1 %4025 }
 0xc37   : > { %v4048_v34 = vmul.f32 0.015625, %v4026_v49 }
 0xc38   : > { %v4057_v28 = vadd.f32 1e-05, %v4049_v35 }
 0xc39   : > { %v4056_v27 = vadd.f32 1e-05, %v4048_v34 }
 0xc3a   : > { %4985 = vrsqrt.f32 %v4057_v28 }
 0xc3b   : > { %4987 = vrsqrt.f32 %v4056_v27 }
 0xc3c   : > { %v4035_v38 = vpop.xlane.xlu0 %4034 }
 0xc3d   : > { %v4051_v15 = vmul.f32 0.015625, %v4035_v38  ;;  %v4032_v16 = vpop.xlane.xlu1 %4031 }
 0xc3e   : > { %v4050_v52 = vmul.f32 0.015625, %v4032_v16 }
 0xc3f   : > { %v4059_v40 = vadd.f32 1e-05, %v4051_v15 }
 0xc40   : > { %v4058_v36 = vadd.f32 1e-05, %v4050_v52  ;;  %v4041_v24 = vpop.xlane.xlu0 %4040 }
 0xc41   : > { %4989 = vrsqrt.f32 %v4059_v40  ;;  %v4053_v44 = vmul.f32 0.015625, %v4041_v24  ;;  %v4038_v55 = vpop.xlane.xlu1 %4037 }
 0xc42   : > { %4991 = vrsqrt.f32 %v4058_v36  ;;  %v4052_v18 = vmul.f32 0.015625, %v4038_v55 }
 0xc43   : > { %v4061_v50 = vadd.f32 1e-05, %v4053_v44 }
 0xc44   : > { %v4986_v4 = vpop.eup %4985  ;;  %v4060_v42 = vadd.f32 1e-05, %v4052_v18  ;;  %v4047_v19 = vpop.xlane.xlu0 %4046 }
 0xc45   : > { %v4988_v20 = vpop.eup %4987  ;;  %v4073_v21 = vmul.f32 %v4986_v4, %v6040_v62  ;;  %4993 = vrsqrt.f32 %v4061_v50  ;;  %v4055_v53 = vmul.f32 0.015625, %v4047_v19  ;;  %v4044_v56 = vpop.xlane.xlu1 %4043 }
 0xc46   : > { %v4072_v58 = vmul.f32 %v4988_v20, %v6042_v1  ;;  %4995 = vrsqrt.f32 %v4060_v42  ;;  %v4054_v60 = vmul.f32 0.015625, %v4044_v56 }
 0xc47   : > { %v4087_v7 = vmul.f32 %v4350_v48, %v4073_v21  ;;  %v4063_v61 = vadd.f32 1e-05, %v4055_v53 }
 0xc48   : > { %v4086_v54 = vmul.f32 %v4350_v48, %v4072_v58  ;;  %v4062_v9 = vadd.f32 1e-05, %v4054_v60 }
 0xc49   : > { %v4101_v10 = vadd.f32 %v4351_v51, %v4087_v7  ;;  %4997 = vrsqrt.f32 %v4063_v61 }
 0xc4a   : > { %v4100_v0 = vadd.f32 %v4351_v51, %v4086_v54  ;;  %4999 = vrsqrt.f32 %v4062_v9 }
 0xc4b   : > { %v4990_v62 = vpop.eup %4989  ;;  %4109 = vst.msk [vmem:[%s6090_s15 + $0x8] sm:$0xff] %vm489_vm0, %v4101_v10 }
 0xc4c   : > { %v4992_v1 = vpop.eup %4991  ;;  %4108 = vst.msk [vmem:[%s6090_s15] sm:$0xff] %vm489_vm0, %v4100_v0  ;;  %v4075_v11 = vmul.f32 %v4990_v62, %v6050_v43 }
 0xc4d   : > { %v4074_v37 = vmul.f32 %v4992_v1, %v6052_v12 }
 0xc4e   : > { %v4089_v13 = vmul.f32 %v4350_v48, %v4075_v11 }
 0xc4f   : > { %v4994_v14 = vpop.eup %4993  ;;  %v4088_v47 = vmul.f32 %v4350_v48, %v4074_v37 }
 0xc50   : > { %v4996_v41 = vpop.eup %4995  ;;  %v4103_v45 = vadd.f32 %v4351_v51, %v4089_v13  ;;  %v4077_v17 = vmul.f32 %v4994_v14, %v6058_v22 }
 0xc51   : > { %v4102_v57 = vadd.f32 %v4351_v51, %v4088_v47  ;;  %v4076_v23 = vmul.f32 %v4996_v41, %v6061_v59 }
 0xc52   : > { %4111 = vst.msk [vmem:[%s6090_s15 + $0x18] sm:$0xff] %vm489_vm0, %v4103_v45  ;;  %v4091_v63 = vmul.f32 %v4350_v48, %v4077_v17 }
 0xc53   : > { %v4998_v43 = vpop.eup %4997  ;;  %4110 = vst.msk [vmem:[%s6090_s15 + $0x10] sm:$0xff] %vm489_vm0, %v4102_v57  ;;  %v4090_v12 = vmul.f32 %v4350_v48, %v4076_v23 }
 0xc54   : > { %v5000_v25 = vpop.eup %4999  ;;  %v4105_v26 = vadd.f32 %v4351_v51, %v4091_v63  ;;  %v4079_v2 = vmul.f32 %v4998_v43, %v6068_v6 }
 0xc55   : > { %v4104_v3 = vadd.f32 %v4351_v51, %v4090_v12  ;;  %v4078_v22 = vmul.f32 %v5000_v25, %v6071_v29 }
 0xc56   : > { %4113 = vst.msk [vmem:[%s6090_s15 + $0x28] sm:$0xff] %vm489_vm0, %v4105_v26  ;;  %v4093_v59 = vmul.f32 %v4350_v48, %v4079_v2 }
 0xc57   : > { %4112 = vst.msk [vmem:[%s6090_s15 + $0x20] sm:$0xff] %vm489_vm0, %v4104_v3  ;;  %v4092_v5 = vmul.f32 %v4350_v48, %v4078_v22 }
 0xc58   : > { %v4107_v8 = vadd.f32 %v4351_v51, %v4093_v59 }
 0xc59   : > { %v4106_v6 = vadd.f32 %v4351_v51, %v4092_v5 }
 0xc5a   : > { %4115 = vst.msk [vmem:[%s6090_s15 + $0x38] sm:$0xff] %vm489_vm0, %v4107_v8 }
 0xc5b   : > { %4114 = vst.msk [vmem:[%s6090_s15 + $0x30] sm:$0xff] %vm489_vm0, %v4106_v6 }
 0xc5c   : > { %5164 = shalt.err (!%p5161_p13)
}
 0xc5d   : > { %s5165_s23 = scalar_lea.hbm %s6115_s26, 1024  ;;  %s5169_s17 = scalar_lea.hbm %s6206_s12, 2048 }
 0xc5e   : > { %p5166_p0 = scmp.ne.s32.totalorder %s6115_s26, %s5165_s23  ;;  %p5170_p1 = scmp.lt.u32.totalorder %s6115_s26, %s6206_s12 }
 0xc5f   : > { %p5171_p2 = scmp.lt.u32.totalorder %s5169_s17, %s5165_s23  ;;  %p5173_p8 = scmp.lt.u32.totalorder %s5165_s23, %s6115_s26 }
 0xc60   : > { %p5167_p5 = pnand %p5166_p0, %p5455_p6 }
 0xc61   : > { %p5172_p4 = por %p5171_p2, %p5170_p1 }
 0xc62   : > { %p5168_p11 = pneg %p5167_p5 }
 0xc63   : > { %p5174_p10 = por %p5173_p8, %p5172_p4 }
 0xc65   : > { %p5175_p12 = pnand %p5174_p10, %p5168_p11 }
 0xc67   : > { %5178 = shalt.err (!%p5175_p12)
}
 0xc68   : > { %s5242_s30 = smov 128   ;;  %s5243_s14 = smov 8  }
 0xc69   : > { %4825 = dma.vmem_to_hbm [thread:$0]  (%p5455_p6), %s6117_s16, 1024, %s6115_s26, %s4117_s21, %s5242_s30, %s5242_s30, %s5243_s14  }
 0xc6a PF: > { %s6207_s27 = sld [smem:[#allocation16_spill]]  ;;  %s6208_s13 = sld [smem:[#allocation17_spill]] }
 0xc6b   : > { %p6210_p7 = scmp.ge.s32.totalorder %s5225_s20, 2 }
 0xc70   : > { %s4145_s24 = sand.u32 1, %s6207_s27   ;;  %p6209_p3 = scmp.ne.s32.totalorder %s6208_s13, 0 }
 0xc71   : > { %s4146_s29 = scalar_lea.sflag [#allocation4], %s4145_s24 }
 0xc72   : > { %p4845_p9 = pnand %p6210_p7, %p6209_p3 }
 0xc74   : > { %5208 = dma.done.wait (!%p4845_p9), %s4146_s29, 1024  }
 0xc75   : > { %5210 = vsyncadd (!%p4845_p9), %s4146_s29, 4294966272  ;;  %p26_p13 = scmp.ge.s32.totalorder %s5445_s22, 4   ;;  %s6211_s17 = smov %s5217_s18 }
 0xc76   : > { %s6212_s18 = smov %s5221_s19  ;;  %s6213_s19 = smov %s5461_s11 }
 0xc77   : > { %s6214_s20 = smov %s5445_s22  ;;  %28 = sbr.rel (!%p26_p13) target bundleno = 12 (0xc), region = 125 }
 0xc7e   :  { %4151 = vsyncpa [#allocation3], 1 }
 0xc7f   :  { %4153 = vsyncpa [#allocation3 + $0x1], 1 }
 0xc80   :  { %4154 = vsyncpa [#allocation6], 1 }
 0xc81   :  { %4155 = vsyncpa [#allocation9], 1 }
 0xc82   :  { %4156 = vsyncpa [#allocation4], 1 }
 0xc83   :  { %4158 = vsyncpa [#allocation4 + $0x1], 1 }

</bundles_post_ra>
